<compile_context>
chip_gen: v7x
topology: tpu7x:2x2x1
jax: 0.10.0
libtpu: 0.0.40
codegen_flags: <defaults>
</compile_context>

<pallas_src>
import functools
import math

import jax
import jax.numpy as jnp
from jax import lax
from jax.experimental import pallas as pl
from jax.experimental.pallas import tpu as pltpu


def _round_up(a, b):
    return -(-a // b) * b


def _spec(shape, index_map, bufs=None):
    if bufs is None:
        return pl.BlockSpec(shape, index_map)
    return pl.BlockSpec(shape, index_map, pipeline_mode=pl.Buffered(bufs))


def _tcn_kernel(x_ref, w_ref, scale_ref, shift_ref, o_ref, *, D, V_pad, T_BLK, CS, fused):
    # x_ref:     (1, R_rows, CS)      stride-phase-packed, time-padded, (T,V)-flattened input
    #                                  (index_map ignores the T-tile axis -> stays resident)
    # w_ref:     (D*CS, C_out_pad)    taps folded/stacked along the contraction dim
    # scale_ref: (1, C_out_pad) f32   gamma / sqrt(var + eps)            (0 on padded ch)
    # shift_ref: (1, C_out_pad) f32   (conv_bias - mean) * scale + beta  (0 on padded ch)
    # o_ref:     (1, T_BLK*V_pad, C_out_pad)
    ti = pl.program_id(1)
    rows = T_BLK * V_pad
    base = pl.multiple_of(ti * rows, V_pad)

    if fused:
        # Tiny contraction (S*C_in < 128): fold all D taps into a single MXU matmul so the
        # MXU K-dim is D*S*C_in instead of S*C_in.
        taps = [
            x_ref[0, pl.ds(pl.multiple_of(base + d * V_pad, V_pad), rows), :]
            for d in range(D)
        ]
        xcat = taps[0] if D == 1 else jnp.concatenate(taps, axis=-1)   # (rows, D*CS)
        acc = jnp.dot(xcat, w_ref[...], preferred_element_type=jnp.float32)
    else:
        # Wide contraction: per-tap accumulating dots fed directly from x_ref slices.
        # No materialized im2col temp -> much lower VMEM pressure, same MXU cycles.
        acc = None
        for d in range(D):
            xs = x_ref[0, pl.ds(pl.multiple_of(base + d * V_pad, V_pad), rows), :]
            ws = w_ref[pl.ds(d * CS, CS), :]
            part = jnp.dot(xs, ws, preferred_element_type=jnp.float32)
            acc = part if acc is None else acc + part

    # folded-BN (+ conv bias) epilogue in f32, then cast for a lane-dense store.
    y = acc * scale_ref[...] + shift_ref[...]
    o_ref[0] = y.astype(o_ref.dtype)


def tcn_forward(x_nchw, conv_w, conv_b, bn_gamma, bn_beta, bn_mean, bn_var,
                *, kernel_size=9, stride=1, eps=1e-5,
                compute_dtype=jnp.bfloat16, out_dtype=None, t_block=None):
    """x_nchw: (N, C_in, T, V).  conv_w: (C_out, C_in, K, 1).  Returns (N, C_out, T_out, V)."""
    N, C_in, T, V = x_nchw.shape
    C_out = conv_w.shape[0]
    K = kernel_size
    S = stride
    pad = (K - 1) // 2                      # matches the PyTorch module: int((K-1)/2)
    T_out = (T + 2 * pad - K) // S + 1
    D = -(-K // S)                          # taps per stride phase (ceil(K/S))
    out_dtype = x_nchw.dtype if out_dtype is None else out_dtype

    in_item = jnp.dtype(compute_dtype).itemsize
    out_item = jnp.dtype(out_dtype).itemsize
    sub = 8 if in_item >= 4 else (16 if in_item == 2 else 32)
    V_pad = _round_up(V, sub)               # keep every row slice sublane-tile aligned

    CS = S * C_in                           # per-tap contraction width
    KC = D * CS                             # fused contraction width
    fused = CS < 128                        # per review: fold taps only when per-tap K-dim is tiny
    C_out_pad = _round_up(C_out, 128)       # lane-dense output stores (unmasked vst)

    # ---- VMEM-aware tile selection ------------------------------------------------------
    if t_block is None:
        step = max(1, 256 // math.gcd(V_pad, 256))   # rows_blk multiple of 256 (MXU M-dim)
        per_row = (2 * C_out_pad * out_item          # double-buffered output tile
                   + 4 * C_out_pad                   # f32 accumulator
                   + (KC if fused else CS) * in_item)  # im2col temp / per-tap slice
        x_est = 2 * (T_out + D - 1) * V_pad * CS * in_item   # conservative (2 buffers)
        w_est = KC * C_out_pad * in_item
        budget = 24 << 20                   # conservative working-set target (headroom on v7x 64 MiB)
        avail_rows = max((budget - x_est - w_est) // max(per_row, 1), 512)
        t_blk = max(step, (avail_rows // V_pad) // step * step)
        if N == 1:                          # megacore: give the T-tile axis >= 2 steps to shard
            t_blk = min(t_blk, max(step, _round_up(-(-T_out // 2), step)))
        t_block = t_blk
    T_BLK = max(1, min(int(t_block), T_out))
    n_t = -(-T_out // T_BLK)
    T_out_pad = n_t * T_BLK

    R_T = T_out_pad + D - 1                 # coarse (stride-phase) input rows needed
    T_in_rows = S * R_T                     # raw padded-T rows needed (>= T + 2*pad)
    pad_end = T_in_rows - T - pad           # >= pad by construction

    # ---- layout glue (XLA): NCHW -> channels-last, pad, stride-phase pack, flatten ------
    x = jnp.transpose(x_nchw, (0, 2, 3, 1))                              # (N, T, V, C_in)
    x = jnp.pad(x, ((0, 0), (pad, pad_end), (0, V_pad - V), (0, 0)))     # (N, T_in_rows, V_pad, C_in)
    x = x.reshape(N, R_T, S, V_pad, C_in)
    x = jnp.transpose(x, (0, 1, 3, 2, 4))                                # (N, R_T, V_pad, S, C_in)
    x = x.reshape(N, R_T * V_pad, CS).astype(compute_dtype)

    # weights: (C_out, C_in, K, 1) -> (D*S*C_in, C_out_pad); phantom taps & pad channels = 0
    w = jnp.transpose(conv_w[:, :, :, 0], (2, 1, 0))                     # (K, C_in, C_out)
    if D * S > K:
        w = jnp.pad(w, ((0, D * S - K), (0, 0), (0, 0)))
    w = w.reshape(KC, C_out)
    w = jnp.pad(w, ((0, 0), (0, C_out_pad - C_out))).astype(compute_dtype)

    # fold inference-mode BatchNorm (+ conv bias) into per-channel scale/shift (f32)
    inv_std = 1.0 / jnp.sqrt(bn_var.astype(jnp.float32) + eps)
    scale = (bn_gamma * inv_std).astype(jnp.float32)
    shift = ((conv_b - bn_mean) * bn_gamma * inv_std + bn_beta).astype(jnp.float32)
    scale = jnp.pad(scale, (0, C_out_pad - C_out)).reshape(1, C_out_pad)
    shift = jnp.pad(shift, (0, C_out_pad - C_out)).reshape(1, C_out_pad)

    R_rows = R_T * V_pad
    rows_blk = T_BLK * V_pad

    # ---- VMEM accounting: buffering + explicit scoped limit ------------------------------
    x_block_bytes = R_rows * CS * in_item
    w_bytes = KC * C_out_pad * in_item
    # single-buffer big blocks (x only changes on the batch axis, weights never change);
    # tiny blocks keep the default so the hot test/compile path is untouched.
    x_bufs = 1 if 2 * x_block_bytes > (8 << 20) else None
    w_bufs = 1 if 2 * w_bytes > (2 << 20) else None
    need = ((1 if x_bufs == 1 else 2) * x_block_bytes
            + (1 if w_bufs == 1 else 2) * w_bytes
            + 4 * C_out_pad * 4                              # scale/shift (double-buffered)
            + 2 * rows_blk * C_out_pad * out_item            # output tiles
            + rows_blk * C_out_pad * 4                       # f32 accumulator
            + rows_blk * (KC if fused else CS) * in_item)    # im2col temp / tap slice
    vmem_limit = int(min(max(need * 5 // 4, 32 << 20), 100 << 20))

    kern = functools.partial(_tcn_kernel, D=D, V_pad=V_pad, T_BLK=T_BLK, CS=CS, fused=fused)

    flops = 2 * N * T_out * V * K * C_in * C_out
    bytes_accessed = (x.size * x.dtype.itemsize
                      + w.size * w.dtype.itemsize
                      + N * T_out_pad * V_pad * C_out_pad * out_item)

    out_flat = pl.pallas_call(
        kern,
        out_shape=jax.ShapeDtypeStruct((N, T_out_pad * V_pad, C_out_pad), out_dtype),
        grid_spec=pltpu.PrefetchScalarGridSpec(
            num_scalar_prefetch=0,
            grid=(N, n_t),
            in_specs=[
                # whole stride-packed sequence of batch n; resident across T tiles
                _spec((1, R_rows, CS), lambda n, ti: (n, 0, 0), x_bufs),
                # constant-index blocks: DMA'd once, never re-fetched
                _spec((KC, C_out_pad), lambda n, ti: (0, 0), w_bufs),
                _spec((1, C_out_pad), lambda n, ti: (0, 0)),
                _spec((1, C_out_pad), lambda n, ti: (0, 0)),
            ],
            out_specs=pl.BlockSpec((1, rows_blk, C_out_pad), lambda n, ti: (n, ti, 0)),
        ),
        compiler_params=pltpu.CompilerParams(
            dimension_semantics=("parallel", "parallel"),
            vmem_limit_bytes=vmem_limit),
        cost_estimate=pl.CostEstimate(
            flops=flops, transcendentals=0, bytes_accessed=bytes_accessed),
    )(x, w, scale, shift)

    out = out_flat.reshape(N, T_out_pad, V_pad, C_out_pad)[:, :T_out, :V, :C_out]
    return jnp.transpose(out, (0, 3, 1, 2))                              # (N, C_out, T_out, V)


def _reference(x_nchw, conv_w, conv_b, gamma, beta, mean, var, *, stride=1, eps=1e-5):
    K = conv_w.shape[2]
    pad = (K - 1) // 2
    y = lax.conv_general_dilated(
        x_nchw, conv_w, window_strides=(stride, 1),
        padding=[(pad, pad), (0, 0)],
        dimension_numbers=('NCHW', 'OIHW', 'NCHW'))
    y = y + conv_b[None, :, None, None]
    y = (y - mean[None, :, None, None]) / jnp.sqrt(var[None, :, None, None] + eps)
    return y * gamma[None, :, None, None] + beta[None, :, None, None]


if __name__ == "__main__":
    key = jax.random.PRNGKey(0)

    # ---- config 1: module-default init, tiny channels (fused-contraction path) ----------
    N, C_in, C_out, T, V = 2, 4, 8, 16, 16
    K = 9
    k_x, k_w, k2 = jax.random.split(key, 3)
    x = jax.random.normal(k_x, (N, C_in, T, V), jnp.float32)

    # conv: kaiming_normal_(fan_out) -> std = sqrt(2 / (C_out*K*1)); bias = 0
    fan_out = C_out * K * 1
    conv_w = jax.random.normal(k_w, (C_out, C_in, K, 1), jnp.float32) * jnp.sqrt(2.0 / fan_out)
    conv_b = jnp.zeros((C_out,), jnp.float32)
    # bn_init(bn, 1): weight=1, bias=0; running stats default mean=0, var=1
    bn_gamma = jnp.ones((C_out,), jnp.float32)
    bn_beta = jnp.zeros((C_out,), jnp.float32)
    bn_mean = jnp.zeros((C_out,), jnp.float32)
    bn_var = jnp.ones((C_out,), jnp.float32)

    # bf16 MXU operands (default), f32 accumulation, stride 1
    out = tcn_forward(x, conv_w, conv_b, bn_gamma, bn_beta, bn_mean, bn_var,
                      kernel_size=K, stride=1)
    out = jax.block_until_ready(out)
    ref = _reference(x, conv_w, conv_b, bn_gamma, bn_beta, bn_mean, bn_var, stride=1)
    assert out.shape == ref.shape, (out.shape, ref.shape)
    err_bf16 = float(jnp.max(jnp.abs(out - ref)))
    assert err_bf16 < 1e-1, err_bf16   # bf16 operand rounding; accumulation stays f32

    # exactness checks: f32 compute path, stride 1 and stride 2
    for s in (1, 2):
        out32 = tcn_forward(x, conv_w, conv_b, bn_gamma, bn_beta, bn_mean, bn_var,
                            kernel_size=K, stride=s, compute_dtype=jnp.float32)
        out32 = jax.block_until_ready(out32)
        ref_s = _reference(x, conv_w, conv_b, bn_gamma, bn_beta, bn_mean, bn_var, stride=s)
        assert out32.shape == ref_s.shape, (out32.shape, ref_s.shape)
        assert jnp.allclose(out32, ref_s, atol=1e-4, rtol=1e-4), \
            float(jnp.max(jnp.abs(out32 - ref_s)))

    # ---- config 2: wide channels + non-trivial BN (per-tap accumulation path) -----------
    N2, C_in2, C_out2, T2, V2 = 1, 128, 16, 8, 4
    ks = jax.random.split(k2, 7)
    x2 = jax.random.normal(ks[0], (N2, C_in2, T2, V2), jnp.float32)
    conv_w2 = jax.random.normal(ks[1], (C_out2, C_in2, K, 1), jnp.float32) * jnp.sqrt(2.0 / (C_out2 * K))
    conv_b2 = 0.1 * jax.random.normal(ks[2], (C_out2,), jnp.float32)
    g2 = 1.0 + 0.1 * jax.random.normal(ks[3], (C_out2,), jnp.float32)
    b2 = 0.1 * jax.random.normal(ks[4], (C_out2,), jnp.float32)
    m2 = 0.1 * jax.random.normal(ks[5], (C_out2,), jnp.float32)
    v2 = 0.5 + jnp.abs(jax.random.normal(ks[6], (C_out2,), jnp.float32))

    out2 = tcn_forward(x2, conv_w2, conv_b2, g2, b2, m2, v2,
                       kernel_size=K, stride=1, compute_dtype=jnp.float32)
    out2 = jax.block_until_ready(out2)
    ref2 = _reference(x2, conv_w2, conv_b2, g2, b2, m2, v2, stride=1)
    assert out2.shape == ref2.shape, (out2.shape, ref2.shape)
    assert jnp.allclose(out2, ref2, atol=1e-3, rtol=1e-3), \
        float(jnp.max(jnp.abs(out2 - ref2)))

    print("KERNEL_OK")
</pallas_src>

<mosaic_0001>
module attributes {stable_mosaic.version = 11 : i64} {
  func.func @_tcn_kernel(%arg0: i32, %arg1: i32, %arg2: memref<1x384x4xbf16, #tpu.memory_space<vmem>>, %arg3: memref<36x128xbf16, #tpu.memory_space<vmem>>, %arg4: memref<1x128xf32, #tpu.memory_space<vmem>>, %arg5: memref<1x128xf32, #tpu.memory_space<vmem>>, %arg6: memref<1x256x128xf32, #tpu.memory_space<vmem>>) attributes {dimension_semantics = [#tpu.dimension_semantics<parallel>, #tpu.dimension_semantics<parallel>], iteration_bounds = array<i64: 2, 1>, scalar_prefetch = 0 : i64, scratch_operands = 0 : i64, tpu.core_type = #tpu.core_type<tc>, window_params = [{transform_indices = @transform_0, window_bounds = array<i64: 1, 384, 4>}, {pipeline_mode = #tpu.pipeline_mode<synchronous>, transform_indices = @transform_1, window_bounds = array<i64: 36, 128>}, {pipeline_mode = #tpu.pipeline_mode<synchronous>, transform_indices = @transform_2, window_bounds = array<i64: 1, 128>}, {pipeline_mode = #tpu.pipeline_mode<synchronous>, transform_indices = @transform_3, window_bounds = array<i64: 1, 128>}, {transform_indices = @transform_4, window_bounds = array<i64: 1, 256, 128>}]} {
    %c256_i32 = arith.constant 256 : i32
    %0 = arith.muli %arg1, %c256_i32 : i32
    %1 = tpu.assume_multiple %0, 16 : i32
    %c0_i32 = arith.constant 0 : i32
    %2 = arith.addi %1, %c0_i32 : i32
    %3 = tpu.assume_multiple %2, 16 : i32
    %c0 = arith.constant 0 : index
    %4 = arith.index_cast %3 : i32 to index
    %c0_0 = arith.constant 0 : index
    %5 = vector.load %arg2[%c0, %4, %c0_0] : memref<1x384x4xbf16, #tpu.memory_space<vmem>>, vector<1x256x4xbf16>
    %6 = vector.shape_cast %5 : vector<1x256x4xbf16> to vector<256x4xbf16>
    %c16_i32 = arith.constant 16 : i32
    %7 = arith.addi %1, %c16_i32 : i32
    %8 = tpu.assume_multiple %7, 16 : i32
    %c0_1 = arith.constant 0 : index
    %9 = arith.index_cast %8 : i32 to index
    %c0_2 = arith.constant 0 : index
    %10 = vector.load %arg2[%c0_1, %9, %c0_2] : memref<1x384x4xbf16, #tpu.memory_space<vmem>>, vector<1x256x4xbf16>
    %11 = vector.shape_cast %10 : vector<1x256x4xbf16> to vector<256x4xbf16>
    %c32_i32 = arith.constant 32 : i32
    %12 = arith.addi %1, %c32_i32 : i32
    %13 = tpu.assume_multiple %12, 16 : i32
    %c0_3 = arith.constant 0 : index
    %14 = arith.index_cast %13 : i32 to index
    %c0_4 = arith.constant 0 : index
    %15 = vector.load %arg2[%c0_3, %14, %c0_4] : memref<1x384x4xbf16, #tpu.memory_space<vmem>>, vector<1x256x4xbf16>
    %16 = vector.shape_cast %15 : vector<1x256x4xbf16> to vector<256x4xbf16>
    %c48_i32 = arith.constant 48 : i32
    %17 = arith.addi %1, %c48_i32 : i32
    %18 = tpu.assume_multiple %17, 16 : i32
    %c0_5 = arith.constant 0 : index
    %19 = arith.index_cast %18 : i32 to index
    %c0_6 = arith.constant 0 : index
    %20 = vector.load %arg2[%c0_5, %19, %c0_6] : memref<1x384x4xbf16, #tpu.memory_space<vmem>>, vector<1x256x4xbf16>
    %21 = vector.shape_cast %20 : vector<1x256x4xbf16> to vector<256x4xbf16>
    %c64_i32 = arith.constant 64 : i32
    %22 = arith.addi %1, %c64_i32 : i32
    %23 = tpu.assume_multiple %22, 16 : i32
    %c0_7 = arith.constant 0 : index
    %24 = arith.index_cast %23 : i32 to index
    %c0_8 = arith.constant 0 : index
    %25 = vector.load %arg2[%c0_7, %24, %c0_8] : memref<1x384x4xbf16, #tpu.memory_space<vmem>>, vector<1x256x4xbf16>
    %26 = vector.shape_cast %25 : vector<1x256x4xbf16> to vector<256x4xbf16>
    %c80_i32 = arith.constant 80 : i32
    %27 = arith.addi %1, %c80_i32 : i32
    %28 = tpu.assume_multiple %27, 16 : i32
    %c0_9 = arith.constant 0 : index
    %29 = arith.index_cast %28 : i32 to index
    %c0_10 = arith.constant 0 : index
    %30 = vector.load %arg2[%c0_9, %29, %c0_10] : memref<1x384x4xbf16, #tpu.memory_space<vmem>>, vector<1x256x4xbf16>
    %31 = vector.shape_cast %30 : vector<1x256x4xbf16> to vector<256x4xbf16>
    %c96_i32 = arith.constant 96 : i32
    %32 = arith.addi %1, %c96_i32 : i32
    %33 = tpu.assume_multiple %32, 16 : i32
    %c0_11 = arith.constant 0 : index
    %34 = arith.index_cast %33 : i32 to index
    %c0_12 = arith.constant 0 : index
    %35 = vector.load %arg2[%c0_11, %34, %c0_12] : memref<1x384x4xbf16, #tpu.memory_space<vmem>>, vector<1x256x4xbf16>
    %36 = vector.shape_cast %35 : vector<1x256x4xbf16> to vector<256x4xbf16>
    %c112_i32 = arith.constant 112 : i32
    %37 = arith.addi %1, %c112_i32 : i32
    %38 = tpu.assume_multiple %37, 16 : i32
    %c0_13 = arith.constant 0 : index
    %39 = arith.index_cast %38 : i32 to index
    %c0_14 = arith.constant 0 : index
    %40 = vector.load %arg2[%c0_13, %39, %c0_14] : memref<1x384x4xbf16, #tpu.memory_space<vmem>>, vector<1x256x4xbf16>
    %41 = vector.shape_cast %40 : vector<1x256x4xbf16> to vector<256x4xbf16>
    %c128_i32 = arith.constant 128 : i32
    %42 = arith.addi %1, %c128_i32 : i32
    %43 = tpu.assume_multiple %42, 16 : i32
    %c0_15 = arith.constant 0 : index
    %44 = arith.index_cast %43 : i32 to index
    %c0_16 = arith.constant 0 : index
    %45 = vector.load %arg2[%c0_15, %44, %c0_16] : memref<1x384x4xbf16, #tpu.memory_space<vmem>>, vector<1x256x4xbf16>
    %46 = vector.shape_cast %45 : vector<1x256x4xbf16> to vector<256x4xbf16>
    %47 = tpu.concatenate %6, %11, %16, %21, %26, %31, %36, %41, %46 in 1 : vector<256x4xbf16>, vector<256x4xbf16>, vector<256x4xbf16>, vector<256x4xbf16>, vector<256x4xbf16>, vector<256x4xbf16>, vector<256x4xbf16>, vector<256x4xbf16>, vector<256x4xbf16> -> vector<256x36xbf16>
    %c0_17 = arith.constant 0 : index
    %c0_18 = arith.constant 0 : index
    %48 = vector.load %arg3[%c0_17, %c0_18] : memref<36x128xbf16, #tpu.memory_space<vmem>>, vector<36x128xbf16>
    %cst = arith.constant dense<0.000000e+00> : vector<256x128xf32>
    %49 = tpu.matmul %47, %48, %cst {dimension_numbers = #tpu.dot_dimension_numbers<[1], [0], [0], [1], [0, 0, 1, 1], [], []>} : vector<256x36xbf16>, vector<36x128xbf16>, vector<256x128xf32> -> vector<256x128xf32>
    %c0_19 = arith.constant 0 : index
    %c0_20 = arith.constant 0 : index
    %50 = vector.load %arg4[%c0_19, %c0_20] : memref<1x128xf32, #tpu.memory_space<vmem>>, vector<1x128xf32>
    %51 = vector.broadcast %50 : vector<1x128xf32> to vector<256x128xf32>
    %52 = arith.mulf %49, %51 : vector<256x128xf32>
    %c0_21 = arith.constant 0 : index
    %c0_22 = arith.constant 0 : index
    %53 = vector.load %arg5[%c0_21, %c0_22] : memref<1x128xf32, #tpu.memory_space<vmem>>, vector<1x128xf32>
    %54 = vector.broadcast %53 : vector<1x128xf32> to vector<256x128xf32>
    %55 = arith.addf %52, %54 : vector<256x128xf32>
    %c0_23 = arith.constant 0 : index
    %c0_24 = arith.constant 0 : index
    %c0_25 = arith.constant 0 : index
    %56 = vector.load %arg6[%c0_23, %c0_24, %c0_25] : memref<1x256x128xf32, #tpu.memory_space<vmem>>, vector<1x256x128xf32>
    %57 = vector.shape_cast %56 : vector<1x256x128xf32> to vector<256x128xf32>
    %58 = vector.shape_cast %55 : vector<256x128xf32> to vector<1x256x128xf32>
    tpu.vector_store %arg6[%c0_23, %c0_24, %c0_25], %58 {strides = array<i32>} : memref<1x256x128xf32, #tpu.memory_space<vmem>>, vector<1x256x128xf32>,
    return
  }
  func.func @transform_0(%arg0: i32, %arg1: i32) -> (i32, i32, i32) {
    %c0_i32 = arith.constant 0 : i32
    %c0_i32_0 = arith.constant 0 : i32
    %c0_i32_1 = arith.constant 0 : i32
    return %arg0, %c0_i32, %c0_i32_0 : i32, i32, i32
  }
  func.func @transform_1(%arg0: i32, %arg1: i32) -> (i32, i32) {
    %c0_i32 = arith.constant 0 : i32
    %c0_i32_0 = arith.constant 0 : i32
    %c0_i32_1 = arith.constant 0 : i32
    return %c0_i32, %c0_i32_0 : i32, i32
  }
  func.func @transform_2(%arg0: i32, %arg1: i32) -> (i32, i32) {
    %c0_i32 = arith.constant 0 : i32
    %c0_i32_0 = arith.constant 0 : i32
    %c0_i32_1 = arith.constant 0 : i32
    return %c0_i32, %c0_i32_0 : i32, i32
  }
  func.func @transform_3(%arg0: i32, %arg1: i32) -> (i32, i32) {
    %c0_i32 = arith.constant 0 : i32
    %c0_i32_0 = arith.constant 0 : i32
    %c0_i32_1 = arith.constant 0 : i32
    return %c0_i32, %c0_i32_0 : i32, i32
  }
  func.func @transform_4(%arg0: i32, %arg1: i32) -> (i32, i32, i32) {
    %c0_i32 = arith.constant 0 : i32
    %c0_i32_0 = arith.constant 0 : i32
    return %arg0, %arg1, %c0_i32 : i32, i32, i32
  }
}

</mosaic_0001>

<bundles_post_ra>
// kernel: tpu_custom_call.1
= control target key start
LH: loop header
LB: loop body
LE: loop exit
PB: predicated region body
PF: predicated region fallthrough
CT: control target
= control target key end

     0   :  { %9 = vsyncpa [#allocation3], 0  ;;  %s3817_s0 = inlined_call_operand.vmem [shape: bf16[2,384,4], index: 0, kind: input, shape index: {}]   ;;  %s3818_s1 = inlined_call_operand.vmem [shape: bf16[36,128], index: 1, kind: input, shape index: {}]   ;;  %s3819_s2 = inlined_call_operand.vmem [shape: f32[1,128], index: 2, kind: input, shape index: {}]   ;;  %s3820_s3 = inlined_call_operand.vmem [shape: f32[1,128], index: 3, kind: input, shape index: {}]   ;;  %s3821_s4 = inlined_call_operand.hbm [shape: f32[2,256,128], index: 4, kind: output, shape index: {}]  }
   0x1   :  { %11 = vsyncpa [#allocation3 + $0x1], 0  ;;  %s3062_s15 = smov 0   ;;  %s3064_s16 = smov 0  }
   0x2   :  { %s3066_s17 = smov 0   ;;  %s3068_s18 = smov 0  }
   0x3   :  { %s3070_s19 = smov 0   ;;  %s3072_s20 = smov 0  }
   0x4 LB: > { %s2236_s21 = sadd.s32 4294967295, %s3025_s20   ;;  %s2237_s22 = sadd.s32 4294967294, %s3025_s20   ;;  %s3025_s20 = sphi %s3072_s20, %s17_s20   ;;  %s3021_s19 = sphi %s3070_s19, %s3828_s19   ;;  %s3017_s18 = sphi %s3068_s18, %s3827_s18   ;;  %s3013_s17 = sphi %s3066_s17, %s3826_s17   ;;  %s3009_s16 = sphi %s3064_s16, %s3825_s16   ;;  %s3005_s15 = sphi %s3062_s15, %s3824_s15  }
   0x5   : > { %s29_s23 = sadd.s32 1, %s3021_s19  ;;  %s127_s24 = sadd.s32 1, %s3013_s17 }
   0x6   : > { %p31_p0 = scmp.ge.s32.totalorder %s29_s23, 2  ;;  %p137_p1 = scmp.ne.s32.totalorder %s3013_s17, %s3009_s16 }
   0x7   : > { %p138_p2 = scmp.eq.s32.totalorder %s2236_s21, 1  ;;  %p143_p3 = scmp.ne.s32.totalorder %s3009_s16, %s3005_s15 }
   0x8   : > { %s3830_s23 = smov (%p31_p0, %s29_s23), 0  ;;  %p144_p5 = scmp.eq.s32.totalorder %s2237_s22, 1 }
   0x9   : > { %p3102_p4 = por %p138_p2, %p137_p1  ;;  %s122_s26 = ssub.s32 %s3021_s19, %s3830_s23 }
   0xa   : > { %p2240_p6 = scmp.ge.s32.totalorder %s3025_s20, 1  ;;  %p125_p7 = scmp.eq.s32.totalorder %s122_s26, 0 }
   0xb   : > { %p3109_p8 = por %p144_p5, %p143_p3  ;;  %p179_p9 = scmp.lt.s32.totalorder %s3025_s20, 3 }
   0xc   : > { %s3115_s28 = scalar_select %p125_p7, %s3013_s17, %s127_s24  }
   0xd   : > { %p180_p10 = pnand %p2240_p6, %p179_p9 }
   0xe   : > { %p205_p11 = scmp.lt.s32.totalorder (!%p180_p10), %s3017_s18, 1  ;;  %s3027_s8 = smov (!%p180_p10), 4   ;;  %v2888_v46 = vld [vmem:[%s3818_s1] sm:$0xff] (!%p180_p10)   ;;  %v2891_v48 = vld [vmem:[%s3818_s1 + $0x8] sm:$0xff] (!%p180_p10)   ;;  %vm1854_vm0 = vcmask (!%p180_p10), 1041408   ;;  %vm1521_vm1 = vcmask (!%p180_p10), 31744  }
   0xf   : > { %183 = sbr.rel (%p180_p10) target bundleno = 631 (0x277), region = 36  ;;  %s3028_s9 = smov (!%p180_p10), 8   ;;  %2689 = vmatprep.subr.bf16.mxu0 (!%p180_p10), %v2888_v46  ;;  %2727 = vmatprep.subr.bf16.mxu1 (!%p180_p10), %v2888_v46  ;;  %v2896_v51 = vld [vmem:[%s3818_s1 + $0x10] ss:$0 sps:$4 sm:$0x33] (!%p180_p10)   ;;  %vm1570_vm2 = vcmask (!%p180_p10), 64512  }
  0x10   : > { %s3029_s10 = smov (!%p180_p10), 12   ;;  %s3030_s11 = smov (!%p180_p10), 16   ;;  %2690 = vmatpush3.bf16.msra.mxu0 (!%p180_p10), %v2888_v46  ;;  %2730 = vmatpush3.bf16.msra.mxu1 (!%p180_p10), %v2888_v46  ;;  %v1856_v53 = vsel (!%p180_p10), %vm1854_vm0, %v2896_v51, 0  ;;  %vm1603_vm3 = vcmask (!%p180_p10), 97280   ;;  %vm1636_vm4 = vcmask (!%p180_p10), 130048   ;;  %vm1669_vm5 = vcmask (!%p180_p10), 162816  }
  0x11   : > { %s3031_s12 = smov (!%p180_p10), 20   ;;  %s3032_s13 = smov (!%p180_p10), 24   ;;  %2691 = vmatprep.subr.bf16.mxu0 (!%p180_p10), %v2891_v48  ;;  %2728 = vmatprep.subr.bf16.mxu1 (!%p180_p10), %v2891_v48  ;;  %vm1702_vm6 = vcmask (!%p180_p10), 195584   ;;  %vm1735_vm7 = vcmask (!%p180_p10), 228352   ;;  %vm1768_vm8 = vcmask (!%p180_p10), 261120   ;;  %vm1821_vm9 = vcmask (!%p180_p10), 293888  }
  0x12   : > { %s3033_s14 = smov (!%p180_p10), 28   ;;  %s3034_s21 = smov (!%p180_p10), 32  }
  0x13   : > { %s202_s6 = sand.u32 (!%p180_p10), 1, %s3009_s16  }
  0x14   : > { %2692 = vmatpush3.bf16.msra.mxu0 (!%p180_p10), %v2891_v48  ;;  %2731 = vmatpush3.bf16.msra.mxu1 (!%p180_p10), %v2891_v48  ;;  %s3770_s26 = scalar_lea.sflag (!%p180_p10), [#allocation3], %s202_s6 }
  0x15   : > { %2733 = vmatprep.subr.msk.bf16.mxu0 (!%p180_p10), %vm1854_vm0, %v2896_v51  ;;  %2734 = vmatprep.subr.msk.bf16.mxu1 (!%p180_p10), %vm1854_vm0, %v2896_v51 }
  0x16   : > { %s206_s29 = scalar_select %p205_p11, %s3017_s18, 1 }
  0x18   : > { %s2735_s30 = smul.u32 192, %s206_s29  ;;  %2694 = vmatpush3.bf16.msra.mxu0 %v1856_v53  ;;  %2732 = vmatpush3.bf16.msra.mxu1 %v1856_v53 }
  0x1a   : > { %s3122_s7 = scalar_lea.vmem %s3817_s0, %s2735_s30  ;;  %s3035_s30 = smov [#allocation2]  }
  0x1b   : > { %v2800_v0 = vld [vmem:[%s3122_s7 + $0x10] sm:$0xff]   ;;  %v2801_v1 = vld [vmem:[%s3122_s7 + $0x8] sm:$0xff]   ;;  %v2806_v6 = vld [vmem:[%s3122_s7 + $0x58] sm:$0xff]   ;;  %s2951_s5 = sshll.u32 %s3035_s30, 4  ;;  %s2952_s5 = int_to_ptr.vmem [resolvable:$false] %s2951_s5 }
  0x1c   : > { %707 = vrot.lane.b32.xlu1 %v2800_v0, %s3027_s8  ;;  %v2802_v2 = vld [vmem:[%s3122_s7 + $0x50] sm:$0xff]   ;;  %705 = vrot.lane.b32.xlu0 %v2801_v1, %s3027_s8  ;;  %v2803_v3 = vld [vmem:[%s3122_s7 + $0x48] sm:$0xff]  }
  0x1d   : > { %v2804_v4 = vld [vmem:[%s3122_s7 + $0x50] sm:$0xff]   ;;  %v2807_v7 = vld [vmem:[%s3122_s7 + $0x18] sm:$0xff]   ;;  %v2810_v10 = vld [vmem:[%s3122_s7 + $0x60] sm:$0xff]  }
  0x1e   : > { %v2805_v5 = vld [vmem:[%s3122_s7 + $0x10] sm:$0xff]   ;;  %v2808_v8 = vld [vmem:[%s3122_s7 + $0x58] sm:$0xff]   ;;  %v2811_v11 = vld [vmem:[%s3122_s7 + $0x20] sm:$0xff]  }
  0x1f   : > { %v2809_v9 = vld [vmem:[%s3122_s7 + $0x18] sm:$0xff]   ;;  %v2812_v12 = vld [vmem:[%s3122_s7 + $0x60] sm:$0xff]   ;;  %v2814_v14 = vld [vmem:[%s3122_s7 + $0x68] sm:$0xff]  }
  0x20   : > { %723 = vrot.lane.b32.xlu1 %v2802_v2, %s3027_s8  ;;  %721 = vrot.lane.b32.xlu0 %v2803_v3, %s3027_s8  ;;  %v2813_v13 = vld [vmem:[%s3122_s7 + $0x20] sm:$0xff]   ;;  %v2815_v15 = vld [vmem:[%s3122_s7 + $0x28] sm:$0xff]  }
  0x21   : > { %v2816_v16 = vld [vmem:[%s3122_s7 + $0x68] sm:$0xff]   ;;  %v2818_v18 = vld [vmem:[%s3122_s7 + $0x70] sm:$0xff]   ;;  %v2822_v22 = vld [vmem:[%s3122_s7 + $0x78] sm:$0xff]  }
  0x22   : > { %v2817_v17 = vld [vmem:[%s3122_s7 + $0x28] sm:$0xff]   ;;  %v2819_v19 = vld [vmem:[%s3122_s7 + $0x30] sm:$0xff]   ;;  %v2823_v23 = vld [vmem:[%s3122_s7 + $0x38] sm:$0xff]  }
  0x23   : > { %v2820_v20 = vld [vmem:[%s3122_s7 + $0x70] sm:$0xff]   ;;  %v2824_v24 = vld [vmem:[%s3122_s7 + $0x78] sm:$0xff]   ;;  %v2826_v26 = vld [vmem:[%s3122_s7 + $0x80] sm:$0xff]  }
  0x24   : > { %833 = vrot.lane.b32.xlu1 %v2804_v4, %s3028_s9  ;;  %817 = vrot.lane.b32.xlu0 %v2805_v5, %s3028_s9  ;;  %v2821_v21 = vld [vmem:[%s3122_s7 + $0x30] sm:$0xff]   ;;  %v2825_v25 = vld [vmem:[%s3122_s7 + $0x38] sm:$0xff]  }
  0x25   : > { %v2827_v27 = vld [vmem:[%s3122_s7 + $0x40] sm:$0xff]   ;;  %v2830_v30 = vld [vmem:[%s3122_s7 + $0x58] sm:$0xff]   ;;  %v2832_v32 = vld [vmem:[%s3122_s7 + $0x88] sm:$0xff]  }
  0x26   : > { %v2828_v28 = vld [vmem:[%s3122_s7 + $0x80] sm:$0xff]   ;;  %v2831_v31 = vld [vmem:[%s3122_s7 + $0x18] sm:$0xff]   ;;  %v2833_v33 = vld [vmem:[%s3122_s7 + $0x48] sm:$0xff]  }
  0x27   : > { %v2829_v29 = vld [vmem:[%s3122_s7 + $0x40] sm:$0xff]   ;;  %v2838_v38 = vld [vmem:[%s3122_s7 + $0x68] sm:$0xff]   ;;  %v2842_v42 = vld [vmem:[%s3122_s7 + $0x70] sm:$0xff]  }
  0x28   : > { %835 = vrot.lane.b32.xlu1 %v2806_v6, %s3028_s9  ;;  %819 = vrot.lane.b32.xlu0 %v2807_v7, %s3028_s9  ;;  %v2834_v34 = vld [vmem:[%s3122_s7 + $0x60] sm:$0xff]   ;;  %v2839_v39 = vld [vmem:[%s3122_s7 + $0x28] sm:$0xff]  }
  0x29   : > { %v2835_v35 = vld [vmem:[%s3122_s7 + $0x20] sm:$0xff]   ;;  %v2840_v40 = vld [vmem:[%s3122_s7 + $0x68] sm:$0xff]   ;;  %v2843_v43 = vld [vmem:[%s3122_s7 + $0x30] sm:$0xff]  }
  0x2a   : > { %v2836_v36 = vld [vmem:[%s3122_s7 + $0x60] sm:$0xff]   ;;  %v2841_v41 = vld [vmem:[%s3122_s7 + $0x28] sm:$0xff]   ;;  %v2844_v44 = vld [vmem:[%s3122_s7 + $0x70] sm:$0xff]  }
  0x2b   : > { %v2837_v37 = vld [vmem:[%s3122_s7 + $0x20] sm:$0xff]   ;;  %v2845_v45 = vld [vmem:[%s3122_s7 + $0x30] sm:$0xff]   ;;  %v2846_v47 = vld [vmem:[%s3122_s7 + $0x78] sm:$0xff]  }
  0x2c   : > { %945 = vrot.lane.b32.xlu1 %v2808_v8, %s3029_s10  ;;  %929 = vrot.lane.b32.xlu0 %v2809_v9, %s3029_s10  ;;  %v2847_v49 = vld [vmem:[%s3122_s7 + $0x38] sm:$0xff]   ;;  %v2850_v54 = vld [vmem:[%s3122_s7 + $0x80] sm:$0xff]  }
  0x2d   : > { %v2848_v50 = vld [vmem:[%s3122_s7 + $0x78] sm:$0xff]   ;;  %v2851_v55 = vld [vmem:[%s3122_s7 + $0x40] sm:$0xff]   ;;  %v2854_v58 = vld [vmem:[%s3122_s7 + $0x88] sm:$0xff]  }
  0x2e   : > { %v2849_v52 = vld [vmem:[%s3122_s7 + $0x38] sm:$0xff]   ;;  %v2852_v56 = vld [vmem:[%s3122_s7 + $0x80] sm:$0xff]   ;;  %v2855_v59 = vld [vmem:[%s3122_s7 + $0x48] sm:$0xff]  }
  0x2f   : > { %v2853_v57 = vld [vmem:[%s3122_s7 + $0x40] sm:$0xff]   ;;  %v2856_v60 = vld [vmem:[%s3122_s7 + $0x88] sm:$0xff]   ;;  %v2860_v62 = vld [vmem:[%s3122_s7 + $0x90] sm:$0xff]  }
  0x30   : > { %947 = vrot.lane.b32.xlu1 %v2810_v10, %s3029_s10  ;;  %931 = vrot.lane.b32.xlu0 %v2811_v11, %s3029_s10  ;;  %v2857_v61 = vld [vmem:[%s3122_s7 + $0x48] sm:$0xff]   ;;  %v2861_v63 = vld [vmem:[%s3122_s7 + $0x50] sm:$0xff]  }
  0x31   : > { %v2864_v2 = vld [vmem:[%s3122_s7 + $0x90] sm:$0xff]   ;;  %v2866_v6 = vld [vmem:[%s3122_s7 + $0x68] sm:$0xff]   ;;  %v2868_v10 = vld [vmem:[%s3122_s7 + $0x98] sm:$0xff]  }
  0x32   : > { %v2865_v3 = vld [vmem:[%s3122_s7 + $0x50] sm:$0xff]   ;;  %v2867_v7 = vld [vmem:[%s3122_s7 + $0x28] sm:$0xff]   ;;  %v2869_v11 = vld [vmem:[%s3122_s7 + $0x58] sm:$0xff]  }
  0x33   : > { %v2863_v46 = vld [vmem:[%s3122_s7 + $0x40] sm:$0xff]   ;;  %v2889_v53 = vld [vmem:[%s3122_s7 + $0x90] sm:$0xff]  }
  0x34   : > { %1057 = vrot.lane.b32.xlu1 %v2812_v12, %s3030_s11  ;;  %1041 = vrot.lane.b32.xlu0 %v2813_v13, %s3030_s11  ;;  %v2859_v48 = vld [vmem:[%s3122_s7] sm:$0xff]  }
  0x38   : > { %1059 = vrot.lane.b32.xlu1 %v2814_v14, %s3030_s11  ;;  %1043 = vrot.lane.b32.xlu0 %v2815_v15, %s3030_s11  ;;  %v2870_v14 = vld [vmem:[%s3122_s7 + $0x70] sm:$0xff]  }
  0x39   : > { %v2871_v15 = vld [vmem:[%s3122_s7 + $0x30] sm:$0xff]  }
  0x3c   : > { %1169 = vrot.lane.b32.xlu1 %v2816_v16, %s3031_s12  ;;  %1153 = vrot.lane.b32.xlu0 %v2817_v17, %s3031_s12 }
  0x40   : > { %1171 = vrot.lane.b32.xlu1 %v2818_v18, %s3031_s12  ;;  %1155 = vrot.lane.b32.xlu0 %v2819_v19, %s3031_s12  ;;  %v2872_v18 = vld [vmem:[%s3122_s7 + $0x70] sm:$0xff]  }
  0x41   : > { %v2873_v19 = vld [vmem:[%s3122_s7 + $0x30] sm:$0xff]  }
  0x44   : > { %1281 = vrot.lane.b32.xlu1 %v2820_v20, %s3032_s13  ;;  %1265 = vrot.lane.b32.xlu0 %v2821_v21, %s3032_s13 }
  0x48   : > { %1283 = vrot.lane.b32.xlu1 %v2822_v22, %s3032_s13  ;;  %1267 = vrot.lane.b32.xlu0 %v2823_v23, %s3032_s13  ;;  %v2874_v22 = vld [vmem:[%s3122_s7 + $0x78] sm:$0xff]  }
  0x49   : > { %v2875_v23 = vld [vmem:[%s3122_s7 + $0x38] sm:$0xff]  }
  0x4c   : > { %1393 = vrot.lane.b32.xlu1 %v2824_v24, %s3033_s14  ;;  %1377 = vrot.lane.b32.xlu0 %v2825_v25, %s3033_s14  ;;  %v2876_v25 = vld [vmem:[%s3122_s7 + $0x78] sm:$0xff]  }
  0x50   : > { %1395 = vrot.lane.b32.xlu1 %v2826_v26, %s3033_s14  ;;  %1379 = vrot.lane.b32.xlu0 %v2827_v27, %s3033_s14  ;;  %v2877_v27 = vld [vmem:[%s3122_s7 + $0x38] sm:$0xff]  }
  0x54   : > { %1505 = vrot.lane.b32.xlu1 %v2828_v28, %s3034_s21  ;;  %1489 = vrot.lane.b32.xlu0 %v2829_v29, %s3034_s21 }
  0x58   : > { %725 = vrot.lane.b32.xlu1 %v2830_v30, %s3027_s8  ;;  %709 = vrot.lane.b32.xlu0 %v2831_v31, %s3027_s8  ;;  %v2878_v30 = vld [vmem:[%s3122_s7 + $0x80] sm:$0xff]  }
  0x59   : > { %v2879_v31 = vld [vmem:[%s3122_s7 + $0x40] sm:$0xff]  }
  0x5c   : > { %1507 = vrot.lane.b32.xlu1 %v2832_v32, %s3034_s21  ;;  %1491 = vrot.lane.b32.xlu0 %v2833_v33, %s3034_s21 }
  0x60   : > { %727 = vrot.lane.b32.xlu1 %v2834_v34, %s3027_s8  ;;  %711 = vrot.lane.b32.xlu0 %v2835_v35, %s3027_s8  ;;  %v2880_v34 = vld [vmem:[%s3122_s7 + $0x80] sm:$0xff]  }
  0x61   : > { %v2881_v35 = vld [vmem:[%s3122_s7 + $0x40] sm:$0xff]  }
  0x64   : > { %837 = vrot.lane.b32.xlu1 %v2836_v36, %s3028_s9  ;;  %821 = vrot.lane.b32.xlu0 %v2837_v37, %s3028_s9 }
  0x68   : > { %839 = vrot.lane.b32.xlu1 %v2838_v38, %s3028_s9  ;;  %823 = vrot.lane.b32.xlu0 %v2839_v39, %s3028_s9  ;;  %v2882_v38 = vld [vmem:[%s3122_s7 + $0x88] sm:$0xff]  }
  0x69   : > { %v2883_v39 = vld [vmem:[%s3122_s7 + $0x48] sm:$0xff]  }
  0x6c   : > { %949 = vrot.lane.b32.xlu1 %v2840_v40, %s3029_s10  ;;  %933 = vrot.lane.b32.xlu0 %v2841_v41, %s3029_s10 }
  0x70   : > { %951 = vrot.lane.b32.xlu1 %v2842_v42, %s3029_s10  ;;  %935 = vrot.lane.b32.xlu0 %v2843_v43, %s3029_s10  ;;  %v2884_v42 = vld [vmem:[%s3122_s7 + $0x88] sm:$0xff]  }
  0x71   : > { %v2885_v43 = vld [vmem:[%s3122_s7 + $0x48] sm:$0xff]  }
  0x74   : > { %1061 = vrot.lane.b32.xlu1 %v2844_v44, %s3030_s11  ;;  %1045 = vrot.lane.b32.xlu0 %v2845_v45, %s3030_s11 }
  0x78   : > { %1063 = vrot.lane.b32.xlu1 %v2846_v47, %s3030_s11  ;;  %1047 = vrot.lane.b32.xlu0 %v2847_v49, %s3030_s11  ;;  %v2886_v47 = vld [vmem:[%s3122_s7 + $0x90] sm:$0xff]  }
  0x79   : > { %v2887_v49 = vld [vmem:[%s3122_s7 + $0x50] sm:$0xff]  }
  0x7c   : > { %1173 = vrot.lane.b32.xlu1 %v2848_v50, %s3031_s12  ;;  %1157 = vrot.lane.b32.xlu0 %v2849_v52, %s3031_s12 }
  0x80   : > { %1175 = vrot.lane.b32.xlu1 %v2850_v54, %s3031_s12  ;;  %1159 = vrot.lane.b32.xlu0 %v2851_v55, %s3031_s12 }
  0x84   : > { %1285 = vrot.lane.b32.xlu1 %v2852_v56, %s3032_s13  ;;  %1269 = vrot.lane.b32.xlu0 %v2853_v57, %s3032_s13  ;;  %v2890_v56 = vld [vmem:[%s3122_s7 + $0x50] sm:$0xff]  }
  0x88   : > { %1287 = vrot.lane.b32.xlu1 %v2854_v58, %s3032_s13  ;;  %1271 = vrot.lane.b32.xlu0 %v2855_v59, %s3032_s13 }
  0x8c   : > { %1397 = vrot.lane.b32.xlu1 %v2856_v60, %s3033_s14  ;;  %1381 = vrot.lane.b32.xlu0 %v2857_v61, %s3033_s14 }
  0x8e   : > { %v3251_v0 = vpop.permute.xlu1 %707  ;;  %v3253_v1 = vpop.permute.xlu0 %705 }
  0x8f   : > { %v1524_v54 = vsel %vm1521_vm1, %v2859_v48, %v3253_v1 }
  0x90   : > { %1399 = vrot.lane.b32.xlu1 %v2860_v62, %s3033_s14  ;;  %1383 = vrot.lane.b32.xlu0 %v2861_v63, %s3033_s14  ;;  %v2862_v63 = vld [vmem:[%s3122_s7 + $0x48] sm:$0xff]  }
  0x92   : > { %v3259_v4 = vpop.permute.xlu1 %723  ;;  %v3261_v5 = vpop.permute.xlu0 %721 }
  0x93   : > { %v1548_v52 = vsel %vm1521_vm1, %v2863_v46, %v3261_v5  ;;  %v2858_v5 = vld [vmem:[%s3122_s7 + $0x8] sm:$0xff]  }
  0x94   : > { %1509 = vrot.lane.b32.xlu1 %v2864_v2, %s3034_s21  ;;  %1493 = vrot.lane.b32.xlu0 %v2865_v3, %s3034_s21  ;;  %v2892_v3 = vld [vmem:[%s3122_s7 + $0x98] sm:$0xff]   ;;  %v2907_v46 = vld [vmem:[%s3122_s7 + $0xa8] sm:$0xff]  }
  0x96   : > { %v3267_v8 = vpop.permute.xlu1 %833  ;;  %v3269_v9 = vpop.permute.xlu0 %817 }
  0x97   : > { %v1588_v55 = vsel %vm1570_vm2, %v1548_v52, %v3267_v8  ;;  %v1572_v57 = vsel %vm1570_vm2, %v1524_v54, %v3269_v9  ;;  %v2893_v8 = vld [vmem:[%s3122_s7 + $0x58] sm:$0xff]   ;;  %v2911_v54 = vld [vmem:[%s3122_s7 + $0x80] sm:$0xff]  }
  0x98   : > { %729 = vrot.lane.b32.xlu1 %v2866_v6, %s3027_s8  ;;  %713 = vrot.lane.b32.xlu0 %v2867_v7, %s3027_s8 }
  0x9a   : > { %v3275_v12 = vpop.permute.xlu1 %835  ;;  %v3277_v13 = vpop.permute.xlu0 %819 }
  0x9c   : > { %1511 = vrot.lane.b32.xlu1 %v2868_v10, %s3034_s21  ;;  %1495 = vrot.lane.b32.xlu0 %v2869_v11, %s3034_s21 }
  0x9e   : > { %v3283_v16 = vpop.permute.xlu1 %945  ;;  %v3285_v17 = vpop.permute.xlu0 %929 }
  0x9f   : > { %v1621_v58 = vsel %vm1603_vm3, %v1588_v55, %v3283_v16  ;;  %v1605_v60 = vsel %vm1603_vm3, %v1572_v57, %v3285_v17  ;;  %v1551_v17 = vsel %vm1521_vm1, %v2862_v63, %v3259_v4  ;;  %v2898_v4 = vld [vmem:[%s3122_s7 + $0x58] sm:$0xff]   ;;  %v2912_v55 = vld [vmem:[%s3122_s7 + $0x40] sm:$0xff]   ;;  %v2916_v63 = vld [vmem:[%s3122_s7 + $0x48] sm:$0xff]  }
  0xa0   : > { %731 = vrot.lane.b32.xlu1 %v2870_v14, %s3027_s8  ;;  %715 = vrot.lane.b32.xlu0 %v2871_v15, %s3027_s8 }
  0xa2   : > { %v3291_v20 = vpop.permute.xlu1 %947  ;;  %v3293_v21 = vpop.permute.xlu0 %931 }
  0xa4   : > { %841 = vrot.lane.b32.xlu1 %v2872_v18, %s3028_s9  ;;  %825 = vrot.lane.b32.xlu0 %v2873_v19, %s3028_s9  ;;  %v2897_v19 = vld [vmem:[%s3122_s7 + $0x98] sm:$0xff]  }
  0xa6   : > { %v1058_v24 = vpop.permute.xlu1 %1057  ;;  %v1042_v26 = vpop.permute.xlu0 %1041 }
  0xa7   : > { %v1654_v61 = vsel %vm1636_vm4, %v1621_v58, %v1058_v24  ;;  %v1638_v1 = vsel %vm1636_vm4, %v1605_v60, %v1042_v26  ;;  %v2913_v58 = vld [vmem:[%s3122_s7 + $0x88] sm:$0xff]  }
  0xa8   : > { %843 = vrot.lane.b32.xlu1 %v2874_v22, %s3028_s9  ;;  %827 = vrot.lane.b32.xlu0 %v2875_v23, %s3028_s9  ;;  %v1527_v22 = vsel %vm1521_vm1, %v2858_v5, %v3251_v0  ;;  %v1590_v23 = vsel %vm1570_vm2, %v1551_v17, %v3275_v12  ;;  %v2918_v5 = vld [vmem:[%s3122_s7 + $0x50] sm:$0xff]  }
  0xa9   : > { %v1574_v24 = vsel %vm1570_vm2, %v1527_v22, %v3277_v13  ;;  %v2899_v13 = vld [vmem:[%s3122_s7 + $0xa0] sm:$0xff]  }
  0xaa   : > { %v3303_v28 = vpop.permute.xlu1 %1059  ;;  %v3305_v29 = vpop.permute.xlu0 %1043  ;;  %v1607_v0 = vsel %vm1603_vm3, %v1574_v24, %v3293_v21  ;;  %v2925_v24 = vld [vmem:[%s3122_s7 + $0xa0] sm:$0xff]  }
  0xac   : > { %953 = vrot.lane.b32.xlu1 %v2876_v25, %s3029_s10  ;;  %937 = vrot.lane.b32.xlu0 %v2877_v27, %s3029_s10  ;;  %v1623_v25 = vsel %vm1603_vm3, %v1590_v23, %v3291_v20 }
  0xad   : > { %v1656_v12 = vsel %vm1636_vm4, %v1623_v25, %v3303_v28  ;;  %v2900_v28 = vld [vmem:[%s3122_s7 + $0x60] sm:$0xff]   ;;  %v2895_v25 = vld [vmem:[%s3122_s7 + $0x10] sm:$0xff]  }
  0xae   : > { %v1170_v32 = vpop.permute.xlu1 %1169  ;;  %v1154_v33 = vpop.permute.xlu0 %1153 }
  0xaf   : > { %v1687_v2 = vsel %vm1669_vm5, %v1654_v61, %v1170_v32  ;;  %v1671_v6 = vsel %vm1669_vm5, %v1638_v1, %v1154_v33 }
  0xb0   : > { %955 = vrot.lane.b32.xlu1 %v2878_v30, %s3029_s10  ;;  %939 = vrot.lane.b32.xlu0 %v2879_v31, %s3029_s10  ;;  %v1640_v30 = vsel %vm1636_vm4, %v1607_v0, %v3305_v29  ;;  %v2926_v0 = vld [vmem:[%s3122_s7 + $0x60] sm:$0xff]  }
  0xb2   : > { %v3315_v36 = vpop.permute.xlu1 %1171  ;;  %v3317_v37 = vpop.permute.xlu0 %1155 }
  0xb3   : > { %v1689_v31 = vsel %vm1669_vm5, %v1656_v12, %v3315_v36  ;;  %v1673_v20 = vsel %vm1669_vm5, %v1640_v30, %v3317_v37 }
  0xb4   : > { %1065 = vrot.lane.b32.xlu1 %v2880_v34, %s3030_s11  ;;  %1049 = vrot.lane.b32.xlu0 %v2881_v35, %s3030_s11 }
  0xb6   : > { %v1282_v40 = vpop.permute.xlu1 %1281  ;;  %v1266_v41 = vpop.permute.xlu0 %1265 }
  0xb7   : > { %v1720_v7 = vsel %vm1702_vm6, %v1687_v2, %v1282_v40  ;;  %v1704_v9 = vsel %vm1702_vm6, %v1671_v6, %v1266_v41 }
  0xb8   : > { %1067 = vrot.lane.b32.xlu1 %v2882_v38, %s3030_s11  ;;  %1051 = vrot.lane.b32.xlu0 %v2883_v39, %s3030_s11  ;;  %v2903_v38 = vld [vmem:[%s3122_s7 + $0xa0] sm:$0xff]  }
  0xb9   : > { %v2904_v39 = vld [vmem:[%s3122_s7 + $0x60] sm:$0xff]  }
  0xba   : > { %v3327_v44 = vpop.permute.xlu1 %1283  ;;  %v3329_v45 = vpop.permute.xlu0 %1267 }
  0xbb   : > { %v1722_v21 = vsel %vm1702_vm6, %v1689_v31, %v3327_v44  ;;  %v1706_v29 = vsel %vm1702_vm6, %v1673_v20, %v3329_v45 }
  0xbc   : > { %1177 = vrot.lane.b32.xlu1 %v2884_v42, %s3031_s12  ;;  %1161 = vrot.lane.b32.xlu0 %v2885_v43, %s3031_s12  ;;  %v2905_v42 = vld [vmem:[%s3122_s7 + $0x78] sm:$0xff]  }
  0xbd   : > { %v2906_v43 = vld [vmem:[%s3122_s7 + $0x38] sm:$0xff]  }
  0xbe   : > { %v1394_v50 = vpop.permute.xlu1 %1393  ;;  %v1378_v51 = vpop.permute.xlu0 %1377 }
  0xbf   : > { %v1753_v10 = vsel %vm1735_vm7, %v1720_v7, %v1394_v50  ;;  %v1737_v14 = vsel %vm1735_vm7, %v1704_v9, %v1378_v51  ;;  %v2909_v50 = vld [vmem:[%s3122_s7 + $0x80] sm:$0xff]   ;;  %v2920_v9 = vld [vmem:[%s3122_s7 + $0x50] sm:$0xff]  }
  0xc0   : > { %1179 = vrot.lane.b32.xlu1 %v2886_v47, %s3031_s12  ;;  %1163 = vrot.lane.b32.xlu0 %v2887_v49, %s3031_s12  ;;  %v2908_v47 = vld [vmem:[%s3122_s7 + $0x68] sm:$0xff]   ;;  %v2910_v51 = vld [vmem:[%s3122_s7 + $0x40] sm:$0xff]  }
  0xc2   : > { %v1396_v59 = vpop.permute.xlu1 %1395  ;;  %v1380_v62 = vpop.permute.xlu0 %1379 }
  0xc3   : > { %v1755_v32 = vsel %vm1735_vm7, %v1722_v21, %v1396_v59  ;;  %v1739_v34 = vsel %vm1735_vm7, %v1706_v29, %v1380_v62  ;;  %v2914_v59 = vld [vmem:[%s3122_s7 + $0x48] sm:$0xff]  }
  0xc4   : > { %1289 = vrot.lane.b32.xlu1 %v2889_v53, %s3032_s13  ;;  %1273 = vrot.lane.b32.xlu0 %v2890_v56, %s3032_s13  ;;  %v2915_v62 = vld [vmem:[%s3122_s7 + $0x88] sm:$0xff]  }
  0xc6   : > { %v1506_v11 = vpop.permute.xlu1 %1505  ;;  %v1490_v15 = vpop.permute.xlu0 %1489 }
  0xc7   : > { %v1786_v16 = vsel %vm1768_vm8, %v1753_v10, %v1506_v11  ;;  %v1770_v18 = vsel %vm1768_vm8, %v1737_v14, %v1490_v15  ;;  %v2921_v14 = vld [vmem:[%s3122_s7 + $0x98] sm:$0xff]  }
  0xc8   : > { %1291 = vrot.lane.b32.xlu1 %v2892_v3, %s3032_s13  ;;  %2711 = vmatprep.mubr.msk.bf16.mxu1 %vm1821_vm9, %v1786_v16  ;;  %v2917_v3 = vld [vmem:[%s3122_s7 + $0x90] sm:$0xff]   ;;  %v2922_v15 = vld [vmem:[%s3122_s7 + $0x58] sm:$0xff]  }
  0xc9   : > { %1275 = vrot.lane.b32.xlu0 %v2893_v8, %s3032_s13  ;;  %2695 = vmatprep.mubr.msk.bf16.mxu0 %vm1821_vm9, %v1770_v18  ;;  %v2919_v8 = vld [vmem:[%s3122_s7 + $0x90] sm:$0xff]   ;;  %v2923_v18 = vld [vmem:[%s3122_s7 + $0x98] sm:$0xff]  }
  0xca   : > { %v3385_v26 = vpop.permute.xlu1 %725  ;;  %v3391_v27 = vpop.permute.xlu0 %709 }
  0xcb   : > { %v1530_v20 = vsel %vm1521_vm1, %v2895_v25, %v3391_v27 }
  0xcc   : > { %1401 = vrot.lane.b32.xlu1 %v2897_v19, %s3033_s14  ;;  %v2924_v19 = vld [vmem:[%s3122_s7 + $0x58] sm:$0xff]  }
  0xcd   : > { %1385 = vrot.lane.b32.xlu0 %v2898_v4, %s3033_s14  ;;  %v2894_v4 = vld [vmem:[%s3122_s7 + $0x50] sm:$0xff]  }
  0xce   : > { %v1508_v33 = vpop.permute.xlu1 %1507  ;;  %v1492_v36 = vpop.permute.xlu0 %1491  ;;  %v1554_v31 = vsel %vm1521_vm1, %v2894_v4, %v3385_v26 }
  0xcf   : > { %v1788_v35 = vsel %vm1768_vm8, %v1755_v32, %v1508_v33  ;;  %v1772_v37 = vsel %vm1768_vm8, %v1739_v34, %v1492_v36  ;;  %v2901_v36 = vld [vmem:[%s3122_s7 + $0x58] sm:$0xff]  }
  0xd0   : > { %1403 = vrot.lane.b32.xlu1 %v2899_v13, %s3033_s14  ;;  %2712 = vmatmul.mubr.msk.bf16.vlgmr.msra.gmra.mrb[0].mxu1 %vm1821_vm9, %v1788_v35  ;;  %v2927_v13 = vld [vmem:[%s3122_s7 + $0xa0] sm:$0xff]  }
  0xd1   : > { %1387 = vrot.lane.b32.xlu0 %v2900_v28, %s3033_s14  ;;  %2696 = vmatmul.mubr.msk.bf16.vlgmr.msra.gmra.mrb[0].mxu0 %vm1821_vm9, %v1772_v37  ;;  %v2928_v28 = vld [vmem:[%s3122_s7 + $0x60] sm:$0xff]  }
  0xd2   : > { %v3417_v40 = vpop.permute.xlu1 %727  ;;  %v3419_v41 = vpop.permute.xlu0 %711 }
  0xd4   : > { %1513 = vrot.lane.b32.xlu1 %v2903_v38, %s3034_s21  ;;  %v2929_v38 = vld [vmem:[%s3122_s7 + $0xa8] sm:$0xff]  }
  0xd5   : > { %1497 = vrot.lane.b32.xlu0 %v2904_v39, %s3034_s21  ;;  %v2902_v39 = vld [vmem:[%s3122_s7 + $0x18] sm:$0xff]  }
  0xd6   : > { %v3425_v44 = vpop.permute.xlu1 %837  ;;  %v3427_v45 = vpop.permute.xlu0 %821 }
  0xd7   : > { %v1592_v21 = vsel %vm1570_vm2, %v1554_v31, %v3425_v44  ;;  %v1576_v29 = vsel %vm1570_vm2, %v1530_v20, %v3427_v45  ;;  %v2930_v44 = vld [vmem:[%s3122_s7 + $0x68] sm:$0xff]  }
  0xd8   : > { %733 = vrot.lane.b32.xlu1 %v2905_v42, %s3027_s8 }
  0xd9   : > { %717 = vrot.lane.b32.xlu0 %v2906_v43, %s3027_s8 }
  0xda   : > { %v3433_v48 = vpop.permute.xlu1 %839  ;;  %v3435_v49 = vpop.permute.xlu0 %823 }
  0xdc   : > { %1515 = vrot.lane.b32.xlu1 %v2907_v46, %s3034_s21 }
  0xdd   : > { %1499 = vrot.lane.b32.xlu0 %v2908_v47, %s3034_s21 }
  0xde   : > { %v950_v52 = vpop.permute.xlu1 %949  ;;  %v934_v53 = vpop.permute.xlu0 %933 }
  0xdf   : > { %v1625_v26 = vsel %vm1603_vm3, %v1592_v21, %v950_v52  ;;  %v1609_v33 = vsel %vm1603_vm3, %v1576_v29, %v934_v53  ;;  %v1557_v53 = vsel %vm1521_vm1, %v2901_v36, %v3417_v40  ;;  %v2934_v40 = vld [vmem:[%s3122_s7 + $0x68] sm:$0xff]  }
  0xe0   : > { %735 = vrot.lane.b32.xlu1 %v2909_v50, %s3027_s8 }
  0xe1   : > { %719 = vrot.lane.b32.xlu0 %v2910_v51, %s3027_s8 }
  0xe2   : > { %v3445_v56 = vpop.permute.xlu1 %951  ;;  %v3447_v57 = vpop.permute.xlu0 %935 }
  0xe4   : > { %845 = vrot.lane.b32.xlu1 %v2911_v54, %s3028_s9 }
  0xe5   : > { %829 = vrot.lane.b32.xlu0 %v2912_v55, %s3028_s9  ;;  %v2933_v55 = vld [vmem:[%s3122_s7 + $0xa8] sm:$0xff]  }
  0xe6   : > { %v1062_v60 = vpop.permute.xlu1 %1061  ;;  %v1046_v61 = vpop.permute.xlu0 %1045 }
  0xe7   : > { %v1658_v34 = vsel %vm1636_vm4, %v1625_v26, %v1062_v60  ;;  %v1642_v27 = vsel %vm1636_vm4, %v1609_v33, %v1046_v61 }
  0xe8   : > { %847 = vrot.lane.b32.xlu1 %v2913_v58, %s3028_s9  ;;  %v1533_v58 = vsel %vm1521_vm1, %v2902_v39, %v3419_v41 }
  0xe9   : > { %831 = vrot.lane.b32.xlu0 %v2914_v59, %s3028_s9  ;;  %v1594_v59 = vsel %vm1570_vm2, %v1557_v53, %v3433_v48  ;;  %v1578_v60 = vsel %vm1570_vm2, %v1533_v58, %v3435_v49  ;;  %v2935_v49 = vld [vmem:[%s3122_s7 + $0xb0] sm:$0xff]   ;;  %v2937_v53 = vld [vmem:[%s3122_s7 + $0x68] sm:$0xff]  }
  0xea   : > { %v3457_v1 = vpop.permute.xlu1 %1063  ;;  %v3459_v2 = vpop.permute.xlu0 %1047  ;;  %v1627_v61 = vsel %vm1603_vm3, %v1594_v59, %v3445_v56  ;;  %v2938_v58 = vld [vmem:[%s3122_s7 + $0x28] sm:$0xff]  }
  0xeb   : > { %v1660_v41 = vsel %vm1636_vm4, %v1627_v61, %v3457_v1  ;;  %v2936_v1 = vld [vmem:[%s3122_s7 + $0x70] sm:$0xff]  }
  0xec   : > { %957 = vrot.lane.b32.xlu1 %v2915_v62, %s3029_s10 }
  0xed   : > { %941 = vrot.lane.b32.xlu0 %v2916_v63, %s3029_s10  ;;  %v1611_v63 = vsel %vm1603_vm3, %v1578_v60, %v3447_v57 }
  0xee   : > { %v1174_v6 = vpop.permute.xlu1 %1173  ;;  %v1158_v7 = vpop.permute.xlu0 %1157 }
  0xef   : > { %v1691_v37 = vsel %vm1669_vm5, %v1658_v34, %v1174_v6  ;;  %v1675_v42 = vsel %vm1669_vm5, %v1642_v27, %v1158_v7  ;;  %v2931_v27 = vld [vmem:[%s3122_s7 + $0x60] sm:$0xff]  }
  0xf0   : > { %959 = vrot.lane.b32.xlu1 %v2917_v3, %s3029_s10  ;;  %v1644_v3 = vsel %vm1636_vm4, %v1611_v63, %v3459_v2 }
  0xf1   : > { %943 = vrot.lane.b32.xlu0 %v2918_v5, %s3029_s10  ;;  %s2241_s10 = sshll.u32 %s202_s6, 8 }
  0xf2   : > { %v3469_v10 = vpop.permute.xlu1 %1175  ;;  %v3471_v11 = vpop.permute.xlu0 %1159 }
  0xf3   : > { %v1693_v5 = vsel %vm1669_vm5, %v1660_v41, %v3469_v10  ;;  %v1677_v56 = vsel %vm1669_vm5, %v1644_v3, %v3471_v11 }
  0xf4   : > { %1069 = vrot.lane.b32.xlu1 %v2919_v8, %s3030_s11 }
  0xf5   : > { %1053 = vrot.lane.b32.xlu0 %v2920_v9, %s3030_s11 }
  0xf6   : > { %v1286_v16 = vpop.permute.xlu1 %1285  ;;  %v1270_v17 = vpop.permute.xlu0 %1269 }
  0xf7   : > { %v1724_v43 = vsel %vm1702_vm6, %v1691_v37, %v1286_v16  ;;  %v1708_v45 = vsel %vm1702_vm6, %v1675_v42, %v1270_v17  ;;  %v2932_v37 = vld [vmem:[%s3122_s7 + $0x20] sm:$0xff]  }
  0xf8   : > { %1071 = vrot.lane.b32.xlu1 %v2921_v14, %s3030_s11  ;;  %v2939_v14 = vld [vmem:[%s3122_s7 + $0xb0] sm:$0xff]  }
  0xf9   : > { %1055 = vrot.lane.b32.xlu0 %v2922_v15, %s3030_s11  ;;  %v2940_v15 = vld [vmem:[%s3122_s7 + $0x70] sm:$0xff]  }
  0xfa   : > { %v1288_v22 = vpop.permute.xlu1 %1287  ;;  %v3481_v23 = vpop.permute.xlu0 %1271 }
  0xfb   : > { %v1726_v57 = vsel %vm1702_vm6, %v1693_v5, %v1288_v22  ;;  %v1710_v6 = vsel %vm1702_vm6, %v1677_v56, %v3481_v23 }
  0xfc   : > { %1181 = vrot.lane.b32.xlu1 %v2923_v18, %s3031_s12  ;;  %v2941_v18 = vld [vmem:[%s3122_s7 + $0xb8] sm:$0xff]  }
  0xfd   : > { %1165 = vrot.lane.b32.xlu0 %v2924_v19, %s3031_s12  ;;  %v2942_v19 = vld [vmem:[%s3122_s7 + $0x78] sm:$0xff]  }
  0xfe   : > { %v1398_v12 = vpop.permute.xlu1 %1397  ;;  %v1382_v30 = vpop.permute.xlu0 %1381 }
  0xff   : > { %v1757_v46 = vsel %vm1735_vm7, %v1724_v43, %v1398_v12  ;;  %v1741_v50 = vsel %vm1735_vm7, %v1708_v45, %v1382_v30 }
 0x100   : > { %1183 = vrot.lane.b32.xlu1 %v2925_v24, %s3031_s12 }
 0x101   : > { %1167 = vrot.lane.b32.xlu0 %v2926_v0, %s3031_s12 }
 0x102   : > { %v1400_v32 = vpop.permute.xlu1 %1399  ;;  %v1384_v35 = vpop.permute.xlu0 %1383 }
 0x103   : > { %v1759_v2 = vsel %vm1735_vm7, %v1726_v57, %v1400_v32  ;;  %v1743_v8 = vsel %vm1735_vm7, %v1710_v6, %v1384_v35 }
 0x104   : > { %1293 = vrot.lane.b32.xlu1 %v2927_v13, %s3032_s13 }
 0x105   : > { %1277 = vrot.lane.b32.xlu0 %v2928_v28, %s3032_s13 }
 0x106   : > { %v1510_v47 = vpop.permute.xlu1 %1509  ;;  %v1494_v52 = vpop.permute.xlu0 %1493 }
 0x107   : > { %v1790_v51 = vsel %vm1768_vm8, %v1757_v46, %v1510_v47  ;;  %v1774_v54 = vsel %vm1768_vm8, %v1741_v50, %v1494_v52 }
 0x108   : > { %1295 = vrot.lane.b32.xlu1 %v2929_v38, %s3032_s13  ;;  %2715 = vmatprep.mubr.msk.bf16.mxu1 %vm1821_vm9, %v1790_v51 }
 0x109   : > { %1279 = vrot.lane.b32.xlu0 %v2930_v44, %s3032_s13  ;;  %2699 = vmatprep.mubr.msk.bf16.mxu0 %vm1821_vm9, %v1774_v54  ;;  %s3671_s13 = scalar_lea.vmem [#allocation2], %s2241_s10 }
 0x10a   : > { %v730_v62 = vpop.permute.xlu1 %729  ;;  %v714_v48 = vpop.permute.xlu0 %713 }
 0x10b   : > { %v1560_v42 = vsel %vm1521_vm1, %v2931_v27, %v730_v62  ;;  %v1536_v43 = vsel %vm1521_vm1, %v2932_v37, %v714_v48 }
 0x10c   : > { %1405 = vrot.lane.b32.xlu1 %v2933_v55, %s3033_s14 }
 0x10d   : > { %1389 = vrot.lane.b32.xlu0 %v2934_v40, %s3033_s14 }
 0x10e   : > { %v1512_v7 = vpop.permute.xlu1 %1511  ;;  %v1496_v10 = vpop.permute.xlu0 %1495 }
 0x10f   : > { %v1792_v9 = vsel %vm1768_vm8, %v1759_v2, %v1512_v7  ;;  %v1776_v11 = vsel %vm1768_vm8, %v1743_v8, %v1496_v10 }
 0x110   : > { %1407 = vrot.lane.b32.xlu1 %v2935_v49, %s3033_s14  ;;  %2716 = vmatmul.mubr.msk.bf16.gmra.mrb[4].mxu1 %vm1821_vm9, %v1792_v9 }
 0x111   : > { %1391 = vrot.lane.b32.xlu0 %v2936_v1, %s3033_s14  ;;  %2700 = vmatmul.mubr.msk.bf16.gmra.mrb[4].mxu0 %vm1821_vm9, %v1776_v11  ;;  %s2669_s14 = sshll.u32 %s3017_s18, 12 }
 0x112   : > { %v732_v16 = vpop.permute.xlu1 %731  ;;  %v716_v17 = vpop.permute.xlu0 %715  ;;  %s3758_s24 = scalar_lea.hbm %s3821_s4, %s2669_s14 }
 0x113   : > { %v1563_v3 = vsel %vm1521_vm1, %v2937_v53, %v732_v16  ;;  %v1539_v49 = vsel %vm1521_vm1, %v2938_v58, %v716_v17 }
 0x114   : > { %1517 = vrot.lane.b32.xlu1 %v2939_v14, %s3034_s21 }
 0x115   : > { %1501 = vrot.lane.b32.xlu0 %v2940_v15, %s3034_s21 }
 0x116   : > { %v842_v22 = vpop.permute.xlu1 %841  ;;  %v826_v23 = vpop.permute.xlu0 %825 }
 0x117   : > { %v1596_v44 = vsel %vm1570_vm2, %v1560_v42, %v842_v22  ;;  %v1580_v45 = vsel %vm1570_vm2, %v1536_v43, %v826_v23  ;;  %v2943_v42 = vld [vmem:[%s3122_s7 + $0x70] sm:$0xff]  }
 0x118   : > { %1519 = vrot.lane.b32.xlu1 %v2941_v18, %s3034_s21  ;;  %v2944_v43 = vld [vmem:[%s3122_s7 + $0x30] sm:$0xff]  }
 0x119   : > { %1503 = vrot.lane.b32.xlu0 %v2942_v19, %s3034_s21  ;;  %s2145_s21 = sshll.u32 %s3671_s13, 4  ;;  %s3763_s21 = int_to_ptr.vmem [resolvable:$true] %s2145_s21 }
 0x11a   : > { %v844_v4 = vpop.permute.xlu1 %843  ;;  %v828_v24 = vpop.permute.xlu0 %827  ;;  %s2947_s29 = scalar_lea.vmem %s3763_s21, 4096  ;;  %p2954_p1 = scmp.lt.s32.totalorder %s3763_s21, %s2952_s5 }
 0x11b   : > { %v1598_v56 = vsel %vm1570_vm2, %v1563_v3, %v844_v4  ;;  %v1582_v57 = vsel %vm1570_vm2, %v1539_v49, %v828_v24  ;;  %p2948_p12 = scmp.ne.s32.totalorder %s3763_s21, %s2947_s29 }
 0x11d   : > { %p2949_p13 = pnand %p2948_p12, %p3102_p4 }
 0x11e   : > { %v954_v25 = vpop.permute.xlu1 %953  ;;  %v938_v0 = vpop.permute.xlu0 %937 }
 0x11f   : > { %v1629_v46 = vsel %vm1603_vm3, %v1596_v44, %v954_v25  ;;  %v1613_v50 = vsel %vm1603_vm3, %v1580_v45, %v938_v0  ;;  %p2950_p0 = pneg %p2949_p13 }
 0x122   : > { %v956_v12 = vpop.permute.xlu1 %955  ;;  %v940_v30 = vpop.permute.xlu0 %939 }
 0x123   : > { %v1631_v1 = vsel %vm1603_vm3, %v1598_v56, %v956_v12  ;;  %v1615_v2 = vsel %vm1603_vm3, %v1582_v57, %v940_v30 }
 0x126   : > { %v1066_v31 = vpop.permute.xlu1 %1065  ;;  %v1050_v13 = vpop.permute.xlu0 %1049 }
 0x127   : > { %v1662_v51 = vsel %vm1636_vm4, %v1629_v46, %v1066_v31  ;;  %v1646_v54 = vsel %vm1636_vm4, %v1613_v50, %v1050_v13 }
 0x12a   : > { %v1068_v20 = vpop.permute.xlu1 %1067  ;;  %v1052_v21 = vpop.permute.xlu0 %1051 }
 0x12b   : > { %v1664_v7 = vsel %vm1636_vm4, %v1631_v1, %v1068_v20  ;;  %v1648_v9 = vsel %vm1636_vm4, %v1615_v2, %v1052_v21 }
 0x12e   : > { %v1178_v28 = vpop.permute.xlu1 %1177  ;;  %v1162_v29 = vpop.permute.xlu0 %1161 }
 0x12f   : > { %v1695_v55 = vsel %vm1669_vm5, %v1662_v51, %v1178_v28  ;;  %v1679_v59 = vsel %vm1669_vm5, %v1646_v54, %v1162_v29  ;;  %v2946_v51 = vld [vmem:[%s3122_s7 + $0x38] sm:$0xff]  }
 0x132   : > { %v1180_v26 = vpop.permute.xlu1 %1179  ;;  %v1164_v32 = vpop.permute.xlu0 %1163 }
 0x133   : > { %v1697_v10 = vsel %vm1669_vm5, %v1664_v7, %v1180_v26  ;;  %v1681_v11 = vsel %vm1669_vm5, %v1648_v9, %v1164_v32 }
 0x136   : > { %v1290_v33 = vpop.permute.xlu1 %1289  ;;  %v1274_v34 = vpop.permute.xlu0 %1273 }
 0x137   : > { %v1728_v40 = vsel %vm1702_vm6, %v1695_v55, %v1290_v33  ;;  %v1712_v60 = vsel %vm1702_vm6, %v1679_v59, %v1274_v34 }
 0x13a   : > { %v1292_v35 = vpop.permute.xlu1 %1291 }
 0x13b   : > { %v1276_v36 = vpop.permute.xlu0 %1275  ;;  %v1730_v14 = vsel %vm1702_vm6, %v1697_v10, %v1292_v35 }
 0x13c   : > { %v1714_v15 = vsel %vm1702_vm6, %v1681_v11, %v1276_v36 }
 0x13e   : > { %v1402_v38 = vpop.permute.xlu1 %1401 }
 0x13f   : > { %v1386_v39 = vpop.permute.xlu0 %1385  ;;  %v1761_v61 = vsel %vm1735_vm7, %v1728_v40, %v1402_v38 }
 0x140   : > { %v1745_v63 = vsel %vm1735_vm7, %v1712_v60, %v1386_v39 }
 0x142   : > { %v1404_v47 = vpop.permute.xlu1 %1403 }
 0x143   : > { %v1388_v52 = vpop.permute.xlu0 %1387  ;;  %v1763_v16 = vsel %vm1735_vm7, %v1730_v14, %v1404_v47  ;;  %v2945_v47 = vld [vmem:[%s3122_s7 + $0x78] sm:$0xff]   ;;  %s2953_s7 = scalar_lea.vmem %s2952_s5, 8192 }
 0x144   : > { %v1747_v18 = vsel %vm1735_vm7, %v1714_v15, %v1388_v52  ;;  %p2955_p2 = scmp.lt.s32.totalorder %s2953_s7, %s2947_s29 }
 0x146   : > { %v1514_v62 = vpop.permute.xlu1 %1513  ;;  %p2956_p3 = por %p2955_p2, %p2954_p1 }
 0x147   : > { %v1794_v41 = vsel %vm1768_vm8, %v1761_v61, %v1514_v62  ;;  %v1498_v48 = vpop.permute.xlu0 %1497 }
 0x148   : > { %v1778_v5 = vsel %vm1768_vm8, %v1745_v63, %v1498_v48  ;;  %2719 = vmatprep.mubr.msk.bf16.mxu1 %vm1821_vm9, %v1794_v41  ;;  %p2957_p5 = pnand %p2956_p3, %p2950_p0 }
 0x149   : > { %2703 = vmatprep.mubr.msk.bf16.mxu0 %vm1821_vm9, %v1778_v5 }
 0x14a   : > { %v734_v6 = vpop.permute.xlu1 %733 }
 0x14b   : > { %v718_v8 = vpop.permute.xlu0 %717  ;;  %v1566_v46 = vsel %vm1521_vm1, %v2943_v42, %v734_v6 }
 0x14c   : > { %v1542_v50 = vsel %vm1521_vm1, %v2944_v43, %v718_v8 }
 0x14e   : > { %v1516_v17 = vpop.permute.xlu1 %1515 }
 0x14f   : > { %v1796_v19 = vsel %vm1768_vm8, %v1763_v16, %v1516_v17  ;;  %v1500_v22 = vpop.permute.xlu0 %1499 }
 0x150   : > { %v1780_v23 = vsel %vm1768_vm8, %v1747_v18, %v1500_v22  ;;  %2720 = vmatmul.mubr.msk.bf16.gmra.mrb[8].mxu1 %vm1821_vm9, %v1796_v19 }
 0x151   : > { %2704 = vmatmul.mubr.msk.bf16.gmra.mrb[8].mxu0 %vm1821_vm9, %v1780_v23 }
 0x152   : > { %v736_v4 = vpop.permute.xlu1 %735 }
 0x153   : > { %v720_v24 = vpop.permute.xlu0 %719  ;;  %v1569_v60 = vsel %vm1521_vm1, %v2945_v47, %v736_v4 }
 0x154   : > { %v1545_v63 = vsel %vm1521_vm1, %v2946_v51, %v720_v24 }
 0x156   : > { %v846_v25 = vpop.permute.xlu1 %845 }
 0x157   : > { %v830_v0 = vpop.permute.xlu0 %829  ;;  %v1600_v52 = vsel %vm1570_vm2, %v1566_v46, %v846_v25  ;;  %v3652_v25 = vld [vmem:[%s3819_s2] ss:$0 sm:$0xff] }
 0x158   : > { %v1584_v53 = vsel %vm1570_vm2, %v1542_v50, %v830_v0  ;;  %v3659_v0 = vld [vmem:[%s3820_s3] ss:$0 sm:$0xff] }
 0x15a   : > { %v848_v12 = vpop.permute.xlu1 %847 }
 0x15b   : > { %v832_v30 = vpop.permute.xlu0 %831  ;;  %v1602_v41 = vsel %vm1570_vm2, %v1569_v60, %v848_v12 }
 0x15c   : > { %v1586_v5 = vsel %vm1570_vm2, %v1545_v63, %v832_v30 }
 0x15e   : > { %v958_v31 = vpop.permute.xlu1 %957 }
 0x15f   : > { %v942_v13 = vpop.permute.xlu0 %941  ;;  %v1633_v54 = vsel %vm1603_vm3, %v1600_v52, %v958_v31 }
 0x160   : > { %v1617_v58 = vsel %vm1603_vm3, %v1584_v53, %v942_v13 }
 0x162   : > { %v960_v20 = vpop.permute.xlu1 %959 }
 0x163   : > { %v944_v21 = vpop.permute.xlu0 %943  ;;  %v1635_v49 = vsel %vm1603_vm3, %v1602_v41, %v960_v20 }
 0x164   : > { %v1619_v6 = vsel %vm1603_vm3, %v1586_v5, %v944_v21 }
 0x166   : > { %v1070_v28 = vpop.permute.xlu1 %1069 }
 0x167   : > { %v1054_v29 = vpop.permute.xlu0 %1053  ;;  %v1666_v59 = vsel %vm1636_vm4, %v1633_v54, %v1070_v28 }
 0x168   : > { %v1650_v61 = vsel %vm1636_vm4, %v1617_v58, %v1054_v29 }
 0x16a   : > { %v1072_v26 = vpop.permute.xlu1 %1071 }
 0x16b   : > { %v1056_v32 = vpop.permute.xlu0 %1055  ;;  %v1668_v2 = vsel %vm1636_vm4, %v1635_v49, %v1072_v26 }
 0x16c   : > { %v1652_v10 = vsel %vm1636_vm4, %v1619_v6, %v1056_v32 }
 0x16e   : > { %v1182_v33 = vpop.permute.xlu1 %1181 }
 0x16f   : > { %v1166_v34 = vpop.permute.xlu0 %1165  ;;  %v1699_v62 = vsel %vm1669_vm5, %v1666_v59, %v1182_v33 }
 0x170   : > { %v1683_v48 = vsel %vm1669_vm5, %v1650_v61, %v1166_v34 }
 0x172   : > { %v1184_v35 = vpop.permute.xlu1 %1183 }
 0x173   : > { %v1168_v36 = vpop.permute.xlu0 %1167  ;;  %v1701_v11 = vsel %vm1669_vm5, %v1668_v2, %v1184_v35 }
 0x174   : > { %v1685_v15 = vsel %vm1669_vm5, %v1652_v10, %v1168_v36 }
 0x176   : > { %v1294_v27 = vpop.permute.xlu1 %1293 }
 0x177   : > { %v1278_v37 = vpop.permute.xlu0 %1277  ;;  %v1732_v3 = vsel %vm1702_vm6, %v1699_v62, %v1294_v27 }
 0x178   : > { %v1716_v56 = vsel %vm1702_vm6, %v1683_v48, %v1278_v37 }
 0x17a   : > { %v1296_v38 = vpop.permute.xlu1 %1295 }
 0x17b   : > { %v1280_v39 = vpop.permute.xlu0 %1279  ;;  %v1734_v16 = vsel %vm1702_vm6, %v1701_v11, %v1296_v38 }
 0x17c   : > { %v1718_v17 = vsel %vm1702_vm6, %v1685_v15, %v1280_v39 }
 0x17e   : > { %v1406_v44 = vpop.permute.xlu1 %1405 }
 0x17f   : > { %v1390_v45 = vpop.permute.xlu0 %1389  ;;  %v1765_v57 = vsel %vm1735_vm7, %v1732_v3, %v1406_v44 }
 0x180   : > { %v1749_v7 = vsel %vm1735_vm7, %v1716_v56, %v1390_v45 }
 0x182   : > { %v1408_v55 = vpop.permute.xlu1 %1407 }
 0x183   : > { %v1392_v40 = vpop.permute.xlu0 %1391  ;;  %v1767_v18 = vsel %vm1735_vm7, %v1734_v16, %v1408_v55 }
 0x184   : > { %v1751_v22 = vsel %vm1735_vm7, %v1718_v17, %v1392_v40 }
 0x186   : > { %v1518_v1 = vpop.permute.xlu1 %1517 }
 0x187   : > { %v1798_v8 = vsel %vm1768_vm8, %v1765_v57, %v1518_v1  ;;  %v1502_v9 = vpop.permute.xlu0 %1501 }
 0x188   : > { %v1782_v14 = vsel %vm1768_vm8, %v1749_v7, %v1502_v9  ;;  %2723 = vmatprep.mubr.msk.bf16.mxu1 %vm1821_vm9, %v1798_v8 }
 0x189   : > { %2707 = vmatprep.mubr.msk.bf16.mxu0 %vm1821_vm9, %v1782_v14 }
 0x18a   : > { %v1520_v19 = vpop.permute.xlu1 %1519 }
 0x18b   : > { %v1800_v23 = vsel %vm1768_vm8, %v1767_v18, %v1520_v19  ;;  %v1504_v4 = vpop.permute.xlu0 %1503 }
 0x18c   : > { %v1784_v24 = vsel %vm1768_vm8, %v1751_v22, %v1504_v4  ;;  %2724 = vmatmul.mubr.msk.bf16.gmra.mrb[12].mxu1 %vm1821_vm9, %v1800_v23 }
 0x18d   : > { %2708 = vmatmul.mubr.msk.bf16.gmra.mrb[12].mxu0 %vm1821_vm9, %v1784_v24 }
 0x1a3   : > { %v2713_v12 = vpop.f32.mrb[0].mxu1 }
 0x1a4   : > { %v2697_v30 = vpop.f32.mrb[0].mxu0  ;;  %v2044_v31 = vmul.f32 %v2713_v12, %v3652_v25  ;;  %v1956_v13 = vpop.f32.mrb[1].mxu1 }
 0x1a5   : > { %v2028_v20 = vmul.f32 %v2697_v30, %v3652_v25  ;;  %v1892_v21 = vpop.f32.mrb[1].mxu0  ;;  %v2042_v28 = vmul.f32 %v3652_v25, %v1956_v13  ;;  %v2714_v29 = vpop.f32.mrb[2].mxu1 }
 0x1a6   : > { %v2083_v26 = vadd.f32 %v3659_v0, %v2044_v31  ;;  %v2026_v32 = vmul.f32 %v3652_v25, %v1892_v21  ;;  %v2698_v33 = vpop.f32.mrb[2].mxu0  ;;  %v2045_v34 = vmul.f32 %v2714_v29, %v3652_v25  ;;  %v1959_v35 = vpop.f32.mrb[3].mxu1 }
 0x1a7   : > { %v2067_v36 = vadd.f32 %v3659_v0, %v2028_v20  ;;  %v2081_v27 = vadd.f32 %v3659_v0, %v2042_v28  ;;  %v2029_v37 = vmul.f32 %v2698_v33, %v3652_v25  ;;  %v1895_v38 = vpop.f32.mrb[3].mxu0  ;;  %v2043_v39 = vmul.f32 %v3652_v25, %v1959_v35 }
 0x1a8   : > { %2115 = vst [vmem:[%s3671_s13 + $0x90] sm:$0xff] %v2083_v26  ;;  %v2065_v42 = vadd.f32 %v3659_v0, %v2026_v32  ;;  %v2084_v43 = vadd.f32 %v3659_v0, %v2045_v34  ;;  %v2027_v44 = vmul.f32 %v3652_v25, %v1895_v38 }
 0x1a9   : > { %2099 = vst [vmem:[%s3671_s13 + $0x10] sm:$0xff] %v2067_v36  ;;  %2113 = vst [vmem:[%s3671_s13 + $0x80] sm:$0xff] %v2081_v27  ;;  %v2068_v45 = vadd.f32 %v3659_v0, %v2029_v37  ;;  %v2082_v46 = vadd.f32 %v3659_v0, %v2043_v39 }
 0x1aa   : > { %2097 = vst [vmem:[%s3671_s13] sm:$0xff] %v2065_v42  ;;  %2116 = vst [vmem:[%s3671_s13 + $0x98] sm:$0xff] %v2084_v43  ;;  %v2066_v47 = vadd.f32 %v3659_v0, %v2027_v44 }
 0x1ab   : > { %2100 = vst [vmem:[%s3671_s13 + $0x18] sm:$0xff] %v2068_v45  ;;  %2114 = vst [vmem:[%s3671_s13 + $0x88] sm:$0xff] %v2082_v46 }
 0x1ac   : > { %2098 = vst [vmem:[%s3671_s13 + $0x8] sm:$0xff] %v2066_v47 }
 0x1e3   : > { %v2717_v50 = vpop.f32.mrb[4].mxu1 }
 0x1e4   : > { %v2701_v51 = vpop.f32.mrb[4].mxu0  ;;  %v2048_v52 = vmul.f32 %v2717_v50, %v3652_v25  ;;  %v1972_v53 = vpop.f32.mrb[5].mxu1 }
 0x1e5   : > { %v2032_v54 = vmul.f32 %v2701_v51, %v3652_v25  ;;  %v1908_v55 = vpop.f32.mrb[5].mxu0  ;;  %v2046_v58 = vmul.f32 %v3652_v25, %v1972_v53  ;;  %v2718_v59 = vpop.f32.mrb[6].mxu1 }
 0x1e6   : > { %v2087_v40 = vadd.f32 %v3659_v0, %v2048_v52  ;;  %v2030_v60 = vmul.f32 %v3652_v25, %v1908_v55  ;;  %v2702_v61 = vpop.f32.mrb[6].mxu0  ;;  %v2049_v62 = vmul.f32 %v2718_v59, %v3652_v25  ;;  %v1975_v63 = vpop.f32.mrb[7].mxu1 }
 0x1e7   : > { %v2071_v41 = vadd.f32 %v3659_v0, %v2032_v54  ;;  %v2085_v48 = vadd.f32 %v3659_v0, %v2046_v58  ;;  %v2033_v3 = vmul.f32 %v2702_v61, %v3652_v25  ;;  %v1911_v5 = vpop.f32.mrb[7].mxu0  ;;  %v2047_v49 = vmul.f32 %v3652_v25, %v1975_v63 }
 0x1e8   : > { %2119 = vst [vmem:[%s3671_s13 + $0xb0] sm:$0xff] %v2087_v40  ;;  %v2069_v56 = vadd.f32 %v3659_v0, %v2030_v60  ;;  %v2088_v57 = vadd.f32 %v3659_v0, %v2049_v62  ;;  %v2031_v1 = vmul.f32 %v3652_v25, %v1911_v5 }
 0x1e9   : > { %2103 = vst [vmem:[%s3671_s13 + $0x30] sm:$0xff] %v2071_v41  ;;  %2117 = vst [vmem:[%s3671_s13 + $0xa0] sm:$0xff] %v2085_v48  ;;  %v2072_v6 = vadd.f32 %v3659_v0, %v2033_v3  ;;  %v2086_v2 = vadd.f32 %v3659_v0, %v2047_v49 }
 0x1ea   : > { %2101 = vst [vmem:[%s3671_s13 + $0x20] sm:$0xff] %v2069_v56  ;;  %2120 = vst [vmem:[%s3671_s13 + $0xb8] sm:$0xff] %v2088_v57  ;;  %v2070_v7 = vadd.f32 %v3659_v0, %v2031_v1 }
 0x1eb   : > { %2104 = vst [vmem:[%s3671_s13 + $0x38] sm:$0xff] %v2072_v6  ;;  %2118 = vst [vmem:[%s3671_s13 + $0xa8] sm:$0xff] %v2086_v2 }
 0x1ec   : > { %2102 = vst [vmem:[%s3671_s13 + $0x28] sm:$0xff] %v2070_v7 }
 0x223   : > { %v2721_v8 = vpop.f32.mrb[8].mxu1 }
 0x224   : > { %v2705_v9 = vpop.f32.mrb[8].mxu0  ;;  %v2052_v10 = vmul.f32 %v2721_v8, %v3652_v25  ;;  %v1988_v11 = vpop.f32.mrb[9].mxu1 }
 0x225   : > { %v2036_v14 = vmul.f32 %v2705_v9, %v3652_v25  ;;  %v1924_v15 = vpop.f32.mrb[9].mxu0  ;;  %v2050_v16 = vmul.f32 %v3652_v25, %v1988_v11  ;;  %v2722_v17 = vpop.f32.mrb[10].mxu1 }
 0x226   : > { %v2091_v18 = vadd.f32 %v3659_v0, %v2052_v10  ;;  %v2034_v19 = vmul.f32 %v3652_v25, %v1924_v15  ;;  %v2706_v22 = vpop.f32.mrb[10].mxu0  ;;  %v2053_v23 = vmul.f32 %v2722_v17, %v3652_v25  ;;  %v1991_v4 = vpop.f32.mrb[11].mxu1 }
 0x227   : > { %v2075_v24 = vadd.f32 %v3659_v0, %v2036_v14  ;;  %v2089_v12 = vadd.f32 %v3659_v0, %v2050_v16  ;;  %v2037_v30 = vmul.f32 %v2706_v22, %v3652_v25  ;;  %v1927_v31 = vpop.f32.mrb[11].mxu0  ;;  %v2051_v13 = vmul.f32 %v3652_v25, %v1991_v4 }
 0x228   : > { %2123 = vst [vmem:[%s3671_s13 + $0xd0] sm:$0xff] %v2091_v18  ;;  %v2073_v20 = vadd.f32 %v3659_v0, %v2034_v19  ;;  %v2092_v21 = vadd.f32 %v3659_v0, %v2053_v23  ;;  %v2035_v28 = vmul.f32 %v3652_v25, %v1927_v31 }
 0x229   : > { %2107 = vst [vmem:[%s3671_s13 + $0x50] sm:$0xff] %v2075_v24  ;;  %2121 = vst [vmem:[%s3671_s13 + $0xc0] sm:$0xff] %v2089_v12  ;;  %v2076_v29 = vadd.f32 %v3659_v0, %v2037_v30  ;;  %v2090_v26 = vadd.f32 %v3659_v0, %v2051_v13 }
 0x22a   : > { %2105 = vst [vmem:[%s3671_s13 + $0x40] sm:$0xff] %v2073_v20  ;;  %2124 = vst [vmem:[%s3671_s13 + $0xd8] sm:$0xff] %v2092_v21  ;;  %v2074_v32 = vadd.f32 %v3659_v0, %v2035_v28 }
 0x22b   : > { %2108 = vst [vmem:[%s3671_s13 + $0x58] sm:$0xff] %v2076_v29  ;;  %2122 = vst [vmem:[%s3671_s13 + $0xc8] sm:$0xff] %v2090_v26 }
 0x22c   : > { %2106 = vst [vmem:[%s3671_s13 + $0x48] sm:$0xff] %v2074_v32 }
 0x25f   : > { %v2725_v33 = vpop.f32.mrb[12].mxu1 }
 0x260   : > { %v2709_v34 = vpop.f32.mrb[12].mxu0  ;;  %v2056_v35 = vmul.f32 %v2725_v33, %v3652_v25  ;;  %v2004_v36 = vpop.f32.mrb[13].mxu1 }
 0x261   : > { %v2040_v27 = vmul.f32 %v2709_v34, %v3652_v25  ;;  %v1940_v37 = vpop.f32.mrb[13].mxu0  ;;  %v2054_v38 = vmul.f32 %v3652_v25, %v2004_v36  ;;  %v2726_v39 = vpop.f32.mrb[14].mxu1 }
 0x262   : > { %v2095_v42 = vadd.f32 %v3659_v0, %v2056_v35  ;;  %v2038_v43 = vmul.f32 %v3652_v25, %v1940_v37  ;;  %v2710_v44 = vpop.f32.mrb[14].mxu0  ;;  %v2057_v45 = vmul.f32 %v2726_v39, %v3652_v25  ;;  %v2007_v46 = vpop.f32.mrb[15].mxu1 }
 0x263   : > { %v2079_v47 = vadd.f32 %v3659_v0, %v2040_v27  ;;  %v2093_v50 = vadd.f32 %v3659_v0, %v2054_v38  ;;  %v2041_v51 = vmul.f32 %v2710_v44, %v3652_v25  ;;  %v1943_v52 = vpop.f32.mrb[15].mxu0  ;;  %v2055_v53 = vmul.f32 %v3652_v25, %v2007_v46 }
 0x264   : > { %2127 = vst [vmem:[%s3671_s13 + $0xf0] sm:$0xff] %v2095_v42  ;;  %v2077_v54 = vadd.f32 %v3659_v0, %v2038_v43  ;;  %v2096_v55 = vadd.f32 %v3659_v0, %v2057_v45  ;;  %v2039_v58 = vmul.f32 %v3652_v25, %v1943_v52 }
 0x265   : > { %2111 = vst [vmem:[%s3671_s13 + $0x70] sm:$0xff] %v2079_v47  ;;  %2125 = vst [vmem:[%s3671_s13 + $0xe0] sm:$0xff] %v2093_v50  ;;  %v2080_v59 = vadd.f32 %v3659_v0, %v2041_v51  ;;  %v2094_v40 = vadd.f32 %v3659_v0, %v2055_v53 }
 0x266   : > { %2109 = vst [vmem:[%s3671_s13 + $0x60] sm:$0xff] %v2077_v54  ;;  %2128 = vst [vmem:[%s3671_s13 + $0xf8] sm:$0xff] %v2096_v55  ;;  %v2078_v60 = vadd.f32 %v3659_v0, %v2039_v58 }
 0x267   : > { %2112 = vst [vmem:[%s3671_s13 + $0x78] sm:$0xff] %v2080_v59  ;;  %2126 = vst [vmem:[%s3671_s13 + $0xe8] sm:$0xff] %v2094_v40 }
 0x268   : > { %2110 = vst [vmem:[%s3671_s13 + $0x68] sm:$0xff] %v2078_v60 }
 0x269   : > { %2960 = shalt.err (!%p2957_p5)
}
 0x26a   : > { %s2961_s6 = scalar_lea.hbm %s3758_s24, 4096  ;;  %s2965_s11 = scalar_lea.hbm %s3821_s4, 8192 }
 0x26b   : > { %p2962_p6 = scmp.ne.s32.totalorder %s3758_s24, %s2961_s6  ;;  %p2966_p10 = scmp.lt.u32.totalorder %s3758_s24, %s3821_s4 }
 0x26c   : > { %p2967_p11 = scmp.lt.u32.totalorder %s2965_s11, %s2961_s6  ;;  %p2969_p13 = scmp.lt.u32.totalorder %s2961_s6, %s3758_s24 }
 0x26d   : > { %p2963_p7 = pnand %p2962_p6, %p3102_p4 }
 0x26e   : > { %p2968_p12 = por %p2967_p11, %p2966_p10 }
 0x26f   : > { %p2964_p9 = pneg %p2963_p7 }
 0x270   : > { %p2970_p0 = por %p2969_p13, %p2968_p12 }
 0x272   : > { %p2971_p1 = pnand %p2970_p0, %p2964_p9 }
 0x274   : > { %2974 = shalt.err (!%p2971_p1)
}
 0x275   : > { %s3036_s14 = smov 128  }
 0x276   : > { %2736 = dma.vmem_to_hbm [thread:$0]  (%p3102_p4), %s3763_s21, 4096, %s3758_s24, %s3770_s26, %s3036_s14, %s3036_s14, %s3028_s9  }
 0x277 PF: > { %p2742_p2 = scmp.ge.s32.totalorder %s3025_s20, 2  ;;  %s2160_s18 = sand.u32 1, %s3005_s15  }
 0x278   : > { %s2161_s22 = scalar_lea.sflag [#allocation3], %s2160_s18 }
 0x279   : > { %p2739_p3 = pnand %p2742_p2, %p3109_p8 }
 0x27b   : > { %3000 = dma.done.wait (!%p2739_p3), %s2161_s22, 4096  }
 0x27c   : > { %3002 = vsyncadd (!%p2739_p3), %s2161_s22, 4294963200  ;;  %s17_s20 = sadd.s32 1, %s3025_s20   ;;  %s3824_s15 = smov %s3009_s16 }
 0x27d   : > { %p14_p5 = scmp.ge.s32.totalorder %s17_s20, 4   ;;  %s3825_s16 = smov %s3013_s17 }
 0x27e   : > { %s3826_s17 = smov %s3115_s28  ;;  %s3827_s18 = smov %s3021_s19 }
 0x27f   : > { %s3828_s19 = smov %s3830_s23  ;;  %16 = sbr.rel (!%p14_p5) target bundleno = 4 (0x4), region = 80 }
 0x286   :  { %2166 = vsyncpa [#allocation3], 1 }
 0x287   :  { %2168 = vsyncpa [#allocation3 + $0x1], 1 }

</bundles_post_ra>
